<compile_context>
chip_gen: v6e
topology: v6e:2x2x1
jax: 0.10.0
libtpu: 0.0.40
codegen_flags: <defaults>
</compile_context>

<pallas_src>
import numpy as np

import jax
import jax.numpy as jnp
from jax import lax
from jax.experimental import pallas as pl
from jax.experimental.pallas import tpu as pltpu

# ----------------------------- small config ---------------------------------
VOCAB = 64
BERT_HIDDEN = 96      # stand-in for bert.config.hidden_size
W2V_DIM = 32          # word2vec_embedder.embedding_dim
HIDDEN = BERT_HIDDEN + W2V_DIM   # = 128: exactly one MXU contraction tile
NUM_LABELS = 8        # config['num_labels']
B, T = 32, 8          # 32 sequences -> 2 blocks of 16 -> grid=(2,)
SLAB_W = 128          # packed parameter slab width (lane-dense, unmasked load)


# ---------------- fused classifier + CRF viterbi kernel ---------------------
def crf_fused_kernel(x_ref,        # (B_BLK*T, K) bf16 activations, row = t*B_BLK + b
                     wT_ref,       # (L, K) bf16 classifier weight, pre-transposed (lane-dense)
                     slab_ref,     # (L, 128) f32: [transT | bias | start | end | 0...]
                     mask_ref,     # (T, B_BLK) f32 attention mask (1.0 valid / 0.0 pad)
                     logits_ref,   # out: (L, B_BLK*T) f32  logits^T, lane-dense
                     preds_ref):   # out: (1, B_BLK*T) int32 packed predictions, lane-dense
    L, M = logits_ref.shape
    Tk, Bb = mask_ref.shape

    # ---- unpack the small parameter slab (one DMA for all CRF/classifier params)
    slab = slab_ref[...]
    transT = slab[:, 0:L]               # transT[j, i] = trans[i -> j]
    bias_col = slab[:, L:L + 1]         # (L, 1)
    start_col = slab[:, L + 1:L + 2]    # (L, 1)
    end_col = slab[:, L + 2:L + 3]      # (L, 1)

    # ---- classifier: ONE bf16 MXU contraction (f32 accumulate).  Contracting the
    # last dim of both operands yields logits^T = (L, M) directly: it is both the
    # lane-dense output tile and the (label-on-sublane, token-on-lane) layout the
    # Viterbi recursion consumes, so no transposed twin input / second dot exists.
    logitsT = lax.dot_general(
        wT_ref[...], x_ref[...],
        dimension_numbers=(((1,), (1,)), ((), ())),
        preferred_element_type=jnp.float32) + bias_col           # (L, M) f32
    logits_ref[...] = logitsT                                    # dense (8, 128) store

    lab_col = lax.broadcasted_iota(jnp.int32, (L, Bb), 0)        # label id on sublanes
    # trans[i, :] as (L, 1) columns, hoisted out of the serial recursion
    trans_cols = [transT[:, i:i + 1] for i in range(L)]

    def emit(t):                                                 # (L, Bb) emissions at step t
        return logitsT[:, t * Bb:(t + 1) * Bb]

    # ---- Viterbi forward recursion (f32; batch on lanes, labels on sublanes).
    # Single-orientation carry: the max-plus over the source label is unrolled over
    # L, so every step is VPU adds / max / select on one (L, Bb) tile — no MXU, no
    # XLU reduce and no relayout on the loop-carried chain.
    score = start_col + emit(0)                                  # (L, Bb)
    bp_rows = []                                                 # T-1 small int tiles in regs
    for t in range(1, Tk):
        best = score[0:1, :] + trans_cols[0]                     # candidates from source 0
        bp = jnp.zeros((L, Bb), jnp.int32)
        for i in range(1, L):
            cand = score[i:i + 1, :] + trans_cols[i]             # (1,Bb)+(L,1) -> (L,Bb)
            take = cand > best                                   # strict > == first-index ties
            bp = jnp.where(take, i, bp)
            best = jnp.maximum(best, cand)
        m = mask_ref[t:t + 1, :] > 0.0                           # (1, Bb) per-sequence mask
        score = jnp.where(m, best + emit(t), score)              # padded steps keep score
        bp_rows.append(jnp.where(m, bp, lab_col))                # identity bp on padded steps
    # TODO(synk): for BioBERT-length T (512), switch both unrolled loops to
    # lax.fori_loop(unroll=8) and spill backpointers to a (T, L, B_BLK) VMEM scratch.

    # ---- termination + batched backtrack
    final = score + end_col                                      # (L, Bb)
    best_final = jnp.max(final, axis=0, keepdims=True)           # (1, Bb)
    tag = jnp.min(jnp.where(final == best_final, lab_col, L),
                  axis=0, keepdims=True).astype(jnp.int32)       # first-index argmax, (1, Bb)

    for t in range(Tk - 1, -1, -1):
        # the HBM block stays a dense (1, 128) row; these are tiny in-VMEM writes
        preds_ref[:, t * Bb:(t + 1) * Bb] = tag
        if t > 0:
            bp = bp_rows[t - 1]
            # per-lane lookup bp[tag[b], b] via one-hot select + sublane sum
            tag = jnp.sum(jnp.where(lab_col == tag, bp, 0),
                          axis=0, keepdims=True).astype(jnp.int32)


def crf_forward_decode(x_blk, mask_blk, w, bias, trans, start, end):
    """Fused classifier + viterbi_decode.

    x_blk:    (G, B_BLK*T, K) bf16, rows t-major within a block (row = t*B_BLK + b)
    mask_blk: (G, T, B_BLK) float32
    """
    G, M, K = x_blk.shape
    _, Tx, Bb = mask_blk.shape
    L = w.shape[-1]
    assert M == Tx * Bb and L + 3 <= SLAB_W

    # pack all small CRF/classifier parameters into one lane-dense slab
    slab = jnp.zeros((L, SLAB_W), jnp.float32)
    slab = slab.at[:, :L].set(trans.T)          # transT[j, i] = trans[i, j]
    slab = slab.at[:, L].set(bias)
    slab = slab.at[:, L + 1].set(start)
    slab = slab.at[:, L + 2].set(end)
    wT = w.T.astype(jnp.bfloat16)               # (L, K): lane-dense classifier weight

    logitsT_packed, preds_packed = pl.pallas_call(
        crf_fused_kernel,
        out_shape=(
            jax.ShapeDtypeStruct((G, L, M), jnp.float32),   # logits^T, lane-dense blocks
            jax.ShapeDtypeStruct((G, 1, M), jnp.int32),     # packed preds, lane-dense blocks
        ),
        grid_spec=pltpu.PrefetchScalarGridSpec(
            num_scalar_prefetch=0,
            grid=(G,),
            in_specs=[
                pl.BlockSpec((None, M, K), lambda g: (g, 0, 0)),     # activations (bf16)
                pl.BlockSpec((L, K), lambda g: (0, 0)),              # classifier weight^T
                pl.BlockSpec((L, SLAB_W), lambda g: (0, 0)),         # CRF/bias param slab
                pl.BlockSpec((None, Tx, Bb), lambda g: (g, 0, 0)),   # attention mask
            ],
            out_specs=(
                pl.BlockSpec((None, L, M), lambda g: (g, 0, 0)),
                pl.BlockSpec((None, 1, M), lambda g: (g, 0, 0)),
            ),
        ),
        compiler_params=pltpu.CompilerParams(
            dimension_semantics=("parallel",)),   # independent blocks -> both TCs on v7x
    )(x_blk, wT, slab, mask_blk)
    return preds_packed, logitsT_packed


# ------------------------------ full forward ---------------------------------
def init_params(key):
    ks = jax.random.split(key, 7)
    return dict(
        # TODO(synk): pretrained BioBERT encoder is not reproducible here; replaced
        # by a deterministic embedding table producing last_hidden_state-shaped features.
        bert_emb=jax.random.normal(ks[0], (VOCAB, BERT_HIDDEN), jnp.float32) * 0.02,
        w2v_emb=jax.random.normal(ks[1], (VOCAB, W2V_DIM), jnp.float32) * 0.02,
        cls_w=jax.random.normal(ks[2], (HIDDEN, NUM_LABELS), jnp.float32) * 0.05,
        cls_b=jax.random.normal(ks[3], (NUM_LABELS,), jnp.float32) * 0.01,
        crf_trans=jax.random.normal(ks[4], (NUM_LABELS, NUM_LABELS), jnp.float32) * 0.1,
        crf_start=jax.random.normal(ks[5], (NUM_LABELS,), jnp.float32) * 0.1,
        crf_end=jax.random.normal(ks[6], (NUM_LABELS,), jnp.float32) * 0.1,
    )


def crf_model_forward(params, input_ids, attention_mask):
    Bx, Tx = input_ids.shape
    L = params["cls_w"].shape[-1]
    Bb = min(Bx, max(1, 128 // Tx))    # sequences per block -> B_BLK*T >= 128 tokens when possible
    assert Bx % Bb == 0, "batch must be divisible by the block size"
    G = Bx // Bb

    # "BERT" last_hidden_state and word2vec embeddings (lookup glue in JAX).  Token ids
    # are transposed into the blocked (G, T, B_BLK) layout FIRST, so the activations are
    # gathered directly in the kernel's row order (t-major within a block) and never
    # re-transposed or duplicated at the XLA level.
    ids_blk = input_ids.reshape(G, Bb, Tx).transpose(0, 2, 1)            # (G, T, Bb)
    seq_out = jnp.take(params["bert_emb"], ids_blk, axis=0)              # (G, T, Bb, Hb)
    w2v = jnp.take(params["w2v_emb"], ids_blk, axis=0)                   # (G, T, Bb, E)
    # dropout: eval mode -> identity.  bf16 only for the MXU operands (halves activation
    # DMA, doubles MXU rate on v5e/v6e/v7x); all Viterbi math stays f32 in-kernel.
    x_blk = jnp.concatenate([seq_out, w2v], axis=-1).astype(jnp.bfloat16)
    x_blk = x_blk.reshape(G, Tx * Bb, HIDDEN)                            # row = t*Bb + b

    # torchcrf precondition: mask[:, 0] must be all ones.
    mask_blk = attention_mask.reshape(G, Bb, Tx).transpose(0, 2, 1).astype(jnp.float32)

    preds_packed, logitsT_packed = crf_forward_decode(
        x_blk, mask_blk, params["cls_w"], params["cls_b"],
        params["crf_trans"], params["crf_start"], params["crf_end"])

    # un-pack the lane-dense kernel outputs (cheap XLA-level layout plumbing)
    logits = (logitsT_packed.reshape(G, L, Tx, Bb)
              .transpose(0, 3, 2, 1).reshape(Bx, Tx, L))
    preds = (preds_packed.reshape(G, Tx, Bb)
             .transpose(0, 2, 1).reshape(Bx, Tx))
    # torchcrf returns only the valid prefix per sequence; we return a dense (B, T)
    # array with padded positions zeroed instead.
    preds = preds * attention_mask.astype(jnp.int32)
    return preds, logits


# ------------------------- pure numpy reference ------------------------------
def _ref_viterbi(logits, mask, trans, start, end):
    Bx, Tx, L = logits.shape
    out = np.zeros((Bx, Tx), np.int32)
    for b in range(Bx):
        score = start + logits[b, 0]
        history = []
        for t in range(1, Tx):
            cand = score[:, None] + trans
            best = cand.max(axis=0)
            bp = cand.argmax(axis=0).astype(np.int32)
            if mask[b, t] > 0:
                score = best + logits[b, t]
                history.append(bp)
            else:
                history.append(np.arange(L, dtype=np.int32))
        score = score + end
        tag = int(score.argmax())
        seq = [0] * Tx
        for t in range(Tx - 1, -1, -1):
            seq[t] = tag
            if t > 0:
                tag = int(history[t - 1][tag])
        out[b] = seq
    return out * (mask > 0).astype(np.int32)


def _path_score(logits_b, mask_b, seq_b, trans, start, end):
    n = int(mask_b.sum())
    s = start[seq_b[0]] + logits_b[0, seq_b[0]]
    for t in range(1, n):
        s += trans[seq_b[t - 1], seq_b[t]] + logits_b[t, seq_b[t]]
    s += end[seq_b[n - 1]]
    return float(s)


if __name__ == "__main__":
    key = jax.random.PRNGKey(0)
    pkey, ikey, lkey = jax.random.split(key, 3)
    params = init_params(pkey)

    input_ids = jax.random.randint(ikey, (B, T), 0, VOCAB, dtype=jnp.int32)
    lengths = jax.random.randint(lkey, (B,), 1, T + 1)          # >= 1 so mask[:, 0] == 1
    attention_mask = (jnp.arange(T)[None, :] < lengths[:, None]).astype(jnp.int32)

    fwd = jax.jit(crf_model_forward)
    preds, logits = fwd(params, input_ids, attention_mask)
    jax.block_until_ready((preds, logits))

    # shape / dtype / range checks
    assert logits.shape == (B, T, NUM_LABELS) and logits.dtype == jnp.float32
    assert preds.shape == (B, T) and preds.dtype == jnp.int32
    assert bool(jnp.all(jnp.isfinite(logits)))
    assert bool(jnp.all((preds >= 0) & (preds < NUM_LABELS)))

    # numerical check of the in-kernel classifier (bf16 MXU operands, f32 accumulate)
    ids_np = np.asarray(input_ids)
    x_np = np.concatenate([np.asarray(params["bert_emb"])[ids_np],
                           np.asarray(params["w2v_emb"])[ids_np]], axis=-1)
    x_bf = np.asarray(jnp.asarray(x_np).astype(jnp.bfloat16).astype(jnp.float32))
    w_bf = np.asarray(params["cls_w"].astype(jnp.bfloat16).astype(jnp.float32))
    ref_logits = x_bf @ w_bf + np.asarray(params["cls_b"])
    np.testing.assert_allclose(np.asarray(logits), ref_logits, atol=2e-3, rtol=2e-2)

    # decode check: kernel path must achieve the optimal Viterbi path score
    logits_np = np.asarray(logits)
    mask_np = np.asarray(attention_mask)
    trans_np = np.asarray(params["crf_trans"])
    start_np = np.asarray(params["crf_start"])
    end_np = np.asarray(params["crf_end"])
    ref_preds = _ref_viterbi(logits_np, mask_np, trans_np, start_np, end_np)
    preds_np = np.asarray(preds)
    for b in range(B):
        s_kernel = _path_score(logits_np[b], mask_np[b], preds_np[b],
                               trans_np, start_np, end_np)
        s_ref = _path_score(logits_np[b], mask_np[b], ref_preds[b],
                            trans_np, start_np, end_np)
        assert abs(s_kernel - s_ref) < 1e-3, (b, s_kernel, s_ref)

    print("KERNEL_OK")
</pallas_src>

<mosaic_0001>
module attributes {stable_mosaic.version = 11 : i64} {
  func.func @crf_fused_kernel(%arg0: i32, %arg1: memref<1x128x128xbf16, #tpu.memory_space<vmem>>, %arg2: memref<8x128xbf16, #tpu.memory_space<vmem>>, %arg3: memref<8x128xf32, #tpu.memory_space<vmem>>, %arg4: memref<1x8x16xf32, #tpu.memory_space<vmem>>, %arg5: memref<1x8x128xf32, #tpu.memory_space<vmem>>, %arg6: memref<1x1x128xi32, #tpu.memory_space<vmem>>) attributes {dimension_semantics = [#tpu.dimension_semantics<parallel>], iteration_bounds = array<i64: 2>, scalar_prefetch = 0 : i64, scratch_operands = 0 : i64, tpu.core_type = #tpu.core_type<tc>, window_params = [{transform_indices = @transform_0, window_bounds = array<i64: 1, 128, 128>}, {pipeline_mode = #tpu.pipeline_mode<synchronous>, transform_indices = @transform_1, window_bounds = array<i64: 8, 128>}, {pipeline_mode = #tpu.pipeline_mode<synchronous>, transform_indices = @transform_2, window_bounds = array<i64: 8, 128>}, {transform_indices = @transform_3, window_bounds = array<i64: 1, 8, 16>}, {transform_indices = @transform_4, window_bounds = array<i64: 1, 8, 128>}, {transform_indices = @transform_5, window_bounds = array<i64: 1, 1, 128>}]} {
    %c0 = arith.constant 0 : index
    %c0_0 = arith.constant 0 : index
    %0 = vector.load %arg3[%c0, %c0_0] : memref<8x128xf32, #tpu.memory_space<vmem>>, vector<8x128xf32>
    %1 = vector.extract_strided_slice %0 {offsets = [0, 0], sizes = [8, 8], strides = [1, 1]} : vector<8x128xf32> to vector<8x8xf32>
    %2 = vector.extract_strided_slice %0 {offsets = [0, 8], sizes = [8, 1], strides = [1, 1]} : vector<8x128xf32> to vector<8x1xf32>
    %3 = vector.extract_strided_slice %0 {offsets = [0, 9], sizes = [8, 1], strides = [1, 1]} : vector<8x128xf32> to vector<8x1xf32>
    %4 = vector.extract_strided_slice %0 {offsets = [0, 10], sizes = [8, 1], strides = [1, 1]} : vector<8x128xf32> to vector<8x1xf32>
    %c0_1 = arith.constant 0 : index
    %c0_2 = arith.constant 0 : index
    %5 = vector.load %arg2[%c0_1, %c0_2] : memref<8x128xbf16, #tpu.memory_space<vmem>>, vector<8x128xbf16>
    %c0_3 = arith.constant 0 : index
    %c0_4 = arith.constant 0 : index
    %c0_5 = arith.constant 0 : index
    %6 = vector.load %arg1[%c0_3, %c0_4, %c0_5] : memref<1x128x128xbf16, #tpu.memory_space<vmem>>, vector<1x128x128xbf16>
    %7 = vector.shape_cast %6 : vector<1x128x128xbf16> to vector<128x128xbf16>
    %cst = arith.constant dense<0.000000e+00> : vector<8x128xf32>
    %8 = tpu.matmul %5, %7, %cst {dimension_numbers = #tpu.dot_dimension_numbers<[1], [1], [0], [0], [0, 0, 1, 0], [], []>} : vector<8x128xbf16>, vector<128x128xbf16>, vector<8x128xf32> -> vector<8x128xf32>
    %9 = vector.broadcast %2 : vector<8x1xf32> to vector<8x128xf32>
    %10 = arith.addf %8, %9 : vector<8x128xf32>
    %c0_6 = arith.constant 0 : index
    %c0_7 = arith.constant 0 : index
    %c0_8 = arith.constant 0 : index
    %11 = vector.load %arg5[%c0_6, %c0_7, %c0_8] : memref<1x8x128xf32, #tpu.memory_space<vmem>>, vector<1x8x128xf32>
    %12 = vector.shape_cast %11 : vector<1x8x128xf32> to vector<8x128xf32>
    %13 = vector.shape_cast %10 : vector<8x128xf32> to vector<1x8x128xf32>
    tpu.vector_store %arg5[%c0_6, %c0_7, %c0_8], %13 {strides = array<i32>} : memref<1x8x128xf32, #tpu.memory_space<vmem>>, vector<1x8x128xf32>,
    %14 = tpu.iota {dimensions = array<i32: 0>} : vector<8x16xi32>
    %15 = vector.extract_strided_slice %1 {offsets = [0, 0], sizes = [8, 1], strides = [1, 1]} : vector<8x8xf32> to vector<8x1xf32>
    %16 = vector.extract_strided_slice %1 {offsets = [0, 1], sizes = [8, 1], strides = [1, 1]} : vector<8x8xf32> to vector<8x1xf32>
    %17 = vector.extract_strided_slice %1 {offsets = [0, 2], sizes = [8, 1], strides = [1, 1]} : vector<8x8xf32> to vector<8x1xf32>
    %18 = vector.extract_strided_slice %1 {offsets = [0, 3], sizes = [8, 1], strides = [1, 1]} : vector<8x8xf32> to vector<8x1xf32>
    %19 = vector.extract_strided_slice %1 {offsets = [0, 4], sizes = [8, 1], strides = [1, 1]} : vector<8x8xf32> to vector<8x1xf32>
    %20 = vector.extract_strided_slice %1 {offsets = [0, 5], sizes = [8, 1], strides = [1, 1]} : vector<8x8xf32> to vector<8x1xf32>
    %21 = vector.extract_strided_slice %1 {offsets = [0, 6], sizes = [8, 1], strides = [1, 1]} : vector<8x8xf32> to vector<8x1xf32>
    %22 = vector.extract_strided_slice %1 {offsets = [0, 7], sizes = [8, 1], strides = [1, 1]} : vector<8x8xf32> to vector<8x1xf32>
    %23 = vector.extract_strided_slice %10 {offsets = [0, 0], sizes = [8, 16], strides = [1, 1]} : vector<8x128xf32> to vector<8x16xf32>
    %24 = vector.broadcast %3 : vector<8x1xf32> to vector<8x16xf32>
    %25 = arith.addf %24, %23 : vector<8x16xf32>
    %26 = vector.extract_strided_slice %25 {offsets = [0, 0], sizes = [1, 16], strides = [1, 1]} : vector<8x16xf32> to vector<1x16xf32>
    %27 = vector.broadcast %26 : vector<1x16xf32> to vector<8x16xf32>
    %28 = vector.broadcast %15 : vector<8x1xf32> to vector<8x16xf32>
    %29 = arith.addf %27, %28 : vector<8x16xf32>
    %c0_i32 = arith.constant 0 : i32
    %30 = vector.broadcast %c0_i32 : i32 to vector<8x16xi32>
    %31 = vector.extract_strided_slice %25 {offsets = [1, 0], sizes = [1, 16], strides = [1, 1]} : vector<8x16xf32> to vector<1x16xf32>
    %32 = vector.broadcast %31 : vector<1x16xf32> to vector<8x16xf32>
    %33 = vector.broadcast %16 : vector<8x1xf32> to vector<8x16xf32>
    %34 = arith.addf %32, %33 : vector<8x16xf32>
    %35 = arith.cmpf ogt, %34, %29 : vector<8x16xf32>
    %c1_i32 = arith.constant 1 : i32
    %36 = vector.broadcast %c1_i32 : i32 to vector<8x16xi32>
    %37 = arith.select %35, %36, %30 : vector<8x16xi1>, vector<8x16xi32>
    %38 = arith.maximumf %29, %34 : vector<8x16xf32>
    %39 = vector.extract_strided_slice %25 {offsets = [2, 0], sizes = [1, 16], strides = [1, 1]} : vector<8x16xf32> to vector<1x16xf32>
    %40 = vector.broadcast %39 : vector<1x16xf32> to vector<8x16xf32>
    %41 = vector.broadcast %17 : vector<8x1xf32> to vector<8x16xf32>
    %42 = arith.addf %40, %41 : vector<8x16xf32>
    %43 = arith.cmpf ogt, %42, %38 : vector<8x16xf32>
    %c2_i32 = arith.constant 2 : i32
    %44 = vector.broadcast %c2_i32 : i32 to vector<8x16xi32>
    %45 = arith.select %43, %44, %37 : vector<8x16xi1>, vector<8x16xi32>
    %46 = arith.maximumf %38, %42 : vector<8x16xf32>
    %47 = vector.extract_strided_slice %25 {offsets = [3, 0], sizes = [1, 16], strides = [1, 1]} : vector<8x16xf32> to vector<1x16xf32>
    %48 = vector.broadcast %47 : vector<1x16xf32> to vector<8x16xf32>
    %49 = vector.broadcast %18 : vector<8x1xf32> to vector<8x16xf32>
    %50 = arith.addf %48, %49 : vector<8x16xf32>
    %51 = arith.cmpf ogt, %50, %46 : vector<8x16xf32>
    %c3_i32 = arith.constant 3 : i32
    %52 = vector.broadcast %c3_i32 : i32 to vector<8x16xi32>
    %53 = arith.select %51, %52, %45 : vector<8x16xi1>, vector<8x16xi32>
    %54 = arith.maximumf %46, %50 : vector<8x16xf32>
    %55 = vector.extract_strided_slice %25 {offsets = [4, 0], sizes = [1, 16], strides = [1, 1]} : vector<8x16xf32> to vector<1x16xf32>
    %56 = vector.broadcast %55 : vector<1x16xf32> to vector<8x16xf32>
    %57 = vector.broadcast %19 : vector<8x1xf32> to vector<8x16xf32>
    %58 = arith.addf %56, %57 : vector<8x16xf32>
    %59 = arith.cmpf ogt, %58, %54 : vector<8x16xf32>
    %c4_i32 = arith.constant 4 : i32
    %60 = vector.broadcast %c4_i32 : i32 to vector<8x16xi32>
    %61 = arith.select %59, %60, %53 : vector<8x16xi1>, vector<8x16xi32>
    %62 = arith.maximumf %54, %58 : vector<8x16xf32>
    %63 = vector.extract_strided_slice %25 {offsets = [5, 0], sizes = [1, 16], strides = [1, 1]} : vector<8x16xf32> to vector<1x16xf32>
    %64 = vector.broadcast %63 : vector<1x16xf32> to vector<8x16xf32>
    %65 = vector.broadcast %20 : vector<8x1xf32> to vector<8x16xf32>
    %66 = arith.addf %64, %65 : vector<8x16xf32>
    %67 = arith.cmpf ogt, %66, %62 : vector<8x16xf32>
    %c5_i32 = arith.constant 5 : i32
    %68 = vector.broadcast %c5_i32 : i32 to vector<8x16xi32>
    %69 = arith.select %67, %68, %61 : vector<8x16xi1>, vector<8x16xi32>
    %70 = arith.maximumf %62, %66 : vector<8x16xf32>
    %71 = vector.extract_strided_slice %25 {offsets = [6, 0], sizes = [1, 16], strides = [1, 1]} : vector<8x16xf32> to vector<1x16xf32>
    %72 = vector.broadcast %71 : vector<1x16xf32> to vector<8x16xf32>
    %73 = vector.broadcast %21 : vector<8x1xf32> to vector<8x16xf32>
    %74 = arith.addf %72, %73 : vector<8x16xf32>
    %75 = arith.cmpf ogt, %74, %70 : vector<8x16xf32>
    %c6_i32 = arith.constant 6 : i32
    %76 = vector.broadcast %c6_i32 : i32 to vector<8x16xi32>
    %77 = arith.select %75, %76, %69 : vector<8x16xi1>, vector<8x16xi32>
    %78 = arith.maximumf %70, %74 : vector<8x16xf32>
    %79 = vector.extract_strided_slice %25 {offsets = [7, 0], sizes = [1, 16], strides = [1, 1]} : vector<8x16xf32> to vector<1x16xf32>
    %80 = vector.broadcast %79 : vector<1x16xf32> to vector<8x16xf32>
    %81 = vector.broadcast %22 : vector<8x1xf32> to vector<8x16xf32>
    %82 = arith.addf %80, %81 : vector<8x16xf32>
    %83 = arith.cmpf ogt, %82, %78 : vector<8x16xf32>
    %c7_i32 = arith.constant 7 : i32
    %84 = vector.broadcast %c7_i32 : i32 to vector<8x16xi32>
    %85 = arith.select %83, %84, %77 : vector<8x16xi1>, vector<8x16xi32>
    %86 = arith.maximumf %78, %82 : vector<8x16xf32>
    %c0_9 = arith.constant 0 : index
    %c1 = arith.constant 1 : index
    %c0_10 = arith.constant 0 : index
    %87 = vector.load %arg4[%c0_9, %c1, %c0_10] : memref<1x8x16xf32, #tpu.memory_space<vmem>>, vector<1x1x16xf32>
    %88 = vector.shape_cast %87 : vector<1x1x16xf32> to vector<1x16xf32>
    %cst_11 = arith.constant 0.000000e+00 : f32
    %89 = vector.broadcast %cst_11 : f32 to vector<1x16xf32>
    %90 = arith.cmpf ogt, %88, %89 : vector<1x16xf32>
    %91 = vector.extract_strided_slice %10 {offsets = [0, 16], sizes = [8, 16], strides = [1, 1]} : vector<8x128xf32> to vector<8x16xf32>
    %92 = arith.addf %86, %91 : vector<8x16xf32>
    %93 = vector.shape_cast %90 : vector<1x16xi1> to vector<1x16xi1>
    %94 = vector.broadcast %93 : vector<1x16xi1> to vector<8x16xi1>
    %95 = arith.select %94, %92, %25 : vector<8x16xi1>, vector<8x16xf32>
    %96 = vector.shape_cast %90 : vector<1x16xi1> to vector<1x16xi1>
    %97 = vector.broadcast %96 : vector<1x16xi1> to vector<8x16xi1>
    %98 = arith.select %97, %85, %14 : vector<8x16xi1>, vector<8x16xi32>
    %99 = vector.extract_strided_slice %95 {offsets = [0, 0], sizes = [1, 16], strides = [1, 1]} : vector<8x16xf32> to vector<1x16xf32>
    %100 = vector.broadcast %99 : vector<1x16xf32> to vector<8x16xf32>
    %101 = vector.broadcast %15 : vector<8x1xf32> to vector<8x16xf32>
    %102 = arith.addf %100, %101 : vector<8x16xf32>
    %c0_i32_12 = arith.constant 0 : i32
    %103 = vector.broadcast %c0_i32_12 : i32 to vector<8x16xi32>
    %104 = vector.extract_strided_slice %95 {offsets = [1, 0], sizes = [1, 16], strides = [1, 1]} : vector<8x16xf32> to vector<1x16xf32>
    %105 = vector.broadcast %104 : vector<1x16xf32> to vector<8x16xf32>
    %106 = vector.broadcast %16 : vector<8x1xf32> to vector<8x16xf32>
    %107 = arith.addf %105, %106 : vector<8x16xf32>
    %108 = arith.cmpf ogt, %107, %102 : vector<8x16xf32>
    %c1_i32_13 = arith.constant 1 : i32
    %109 = vector.broadcast %c1_i32_13 : i32 to vector<8x16xi32>
    %110 = arith.select %108, %109, %103 : vector<8x16xi1>, vector<8x16xi32>
    %111 = arith.maximumf %102, %107 : vector<8x16xf32>
    %112 = vector.extract_strided_slice %95 {offsets = [2, 0], sizes = [1, 16], strides = [1, 1]} : vector<8x16xf32> to vector<1x16xf32>
    %113 = vector.broadcast %112 : vector<1x16xf32> to vector<8x16xf32>
    %114 = vector.broadcast %17 : vector<8x1xf32> to vector<8x16xf32>
    %115 = arith.addf %113, %114 : vector<8x16xf32>
    %116 = arith.cmpf ogt, %115, %111 : vector<8x16xf32>
    %c2_i32_14 = arith.constant 2 : i32
    %117 = vector.broadcast %c2_i32_14 : i32 to vector<8x16xi32>
    %118 = arith.select %116, %117, %110 : vector<8x16xi1>, vector<8x16xi32>
    %119 = arith.maximumf %111, %115 : vector<8x16xf32>
    %120 = vector.extract_strided_slice %95 {offsets = [3, 0], sizes = [1, 16], strides = [1, 1]} : vector<8x16xf32> to vector<1x16xf32>
    %121 = vector.broadcast %120 : vector<1x16xf32> to vector<8x16xf32>
    %122 = vector.broadcast %18 : vector<8x1xf32> to vector<8x16xf32>
    %123 = arith.addf %121, %122 : vector<8x16xf32>
    %124 = arith.cmpf ogt, %123, %119 : vector<8x16xf32>
    %c3_i32_15 = arith.constant 3 : i32
    %125 = vector.broadcast %c3_i32_15 : i32 to vector<8x16xi32>
    %126 = arith.select %124, %125, %118 : vector<8x16xi1>, vector<8x16xi32>
    %127 = arith.maximumf %119, %123 : vector<8x16xf32>
    %128 = vector.extract_strided_slice %95 {offsets = [4, 0], sizes = [1, 16], strides = [1, 1]} : vector<8x16xf32> to vector<1x16xf32>
    %129 = vector.broadcast %128 : vector<1x16xf32> to vector<8x16xf32>
    %130 = vector.broadcast %19 : vector<8x1xf32> to vector<8x16xf32>
    %131 = arith.addf %129, %130 : vector<8x16xf32>
    %132 = arith.cmpf ogt, %131, %127 : vector<8x16xf32>
    %c4_i32_16 = arith.constant 4 : i32
    %133 = vector.broadcast %c4_i32_16 : i32 to vector<8x16xi32>
    %134 = arith.select %132, %133, %126 : vector<8x16xi1>, vector<8x16xi32>
    %135 = arith.maximumf %127, %131 : vector<8x16xf32>
    %136 = vector.extract_strided_slice %95 {offsets = [5, 0], sizes = [1, 16], strides = [1, 1]} : vector<8x16xf32> to vector<1x16xf32>
    %137 = vector.broadcast %136 : vector<1x16xf32> to vector<8x16xf32>
    %138 = vector.broadcast %20 : vector<8x1xf32> to vector<8x16xf32>
    %139 = arith.addf %137, %138 : vector<8x16xf32>
    %140 = arith.cmpf ogt, %139, %135 : vector<8x16xf32>
    %c5_i32_17 = arith.constant 5 : i32
    %141 = vector.broadcast %c5_i32_17 : i32 to vector<8x16xi32>
    %142 = arith.select %140, %141, %134 : vector<8x16xi1>, vector<8x16xi32>
    %143 = arith.maximumf %135, %139 : vector<8x16xf32>
    %144 = vector.extract_strided_slice %95 {offsets = [6, 0], sizes = [1, 16], strides = [1, 1]} : vector<8x16xf32> to vector<1x16xf32>
    %145 = vector.broadcast %144 : vector<1x16xf32> to vector<8x16xf32>
    %146 = vector.broadcast %21 : vector<8x1xf32> to vector<8x16xf32>
    %147 = arith.addf %145, %146 : vector<8x16xf32>
    %148 = arith.cmpf ogt, %147, %143 : vector<8x16xf32>
    %c6_i32_18 = arith.constant 6 : i32
    %149 = vector.broadcast %c6_i32_18 : i32 to vector<8x16xi32>
    %150 = arith.select %148, %149, %142 : vector<8x16xi1>, vector<8x16xi32>
    %151 = arith.maximumf %143, %147 : vector<8x16xf32>
    %152 = vector.extract_strided_slice %95 {offsets = [7, 0], sizes = [1, 16], strides = [1, 1]} : vector<8x16xf32> to vector<1x16xf32>
    %153 = vector.broadcast %152 : vector<1x16xf32> to vector<8x16xf32>
    %154 = vector.broadcast %22 : vector<8x1xf32> to vector<8x16xf32>
    %155 = arith.addf %153, %154 : vector<8x16xf32>
    %156 = arith.cmpf ogt, %155, %151 : vector<8x16xf32>
    %c7_i32_19 = arith.constant 7 : i32
    %157 = vector.broadcast %c7_i32_19 : i32 to vector<8x16xi32>
    %158 = arith.select %156, %157, %150 : vector<8x16xi1>, vector<8x16xi32>
    %159 = arith.maximumf %151, %155 : vector<8x16xf32>
    %c0_20 = arith.constant 0 : index
    %c2 = arith.constant 2 : index
    %c0_21 = arith.constant 0 : index
    %160 = vector.load %arg4[%c0_20, %c2, %c0_21] : memref<1x8x16xf32, #tpu.memory_space<vmem>>, vector<1x1x16xf32>
    %161 = vector.shape_cast %160 : vector<1x1x16xf32> to vector<1x16xf32>
    %cst_22 = arith.constant 0.000000e+00 : f32
    %162 = vector.broadcast %cst_22 : f32 to vector<1x16xf32>
    %163 = arith.cmpf ogt, %161, %162 : vector<1x16xf32>
    %164 = vector.extract_strided_slice %10 {offsets = [0, 32], sizes = [8, 16], strides = [1, 1]} : vector<8x128xf32> to vector<8x16xf32>
    %165 = arith.addf %159, %164 : vector<8x16xf32>
    %166 = vector.shape_cast %163 : vector<1x16xi1> to vector<1x16xi1>
    %167 = vector.broadcast %166 : vector<1x16xi1> to vector<8x16xi1>
    %168 = arith.select %167, %165, %95 : vector<8x16xi1>, vector<8x16xf32>
    %169 = vector.shape_cast %163 : vector<1x16xi1> to vector<1x16xi1>
    %170 = vector.broadcast %169 : vector<1x16xi1> to vector<8x16xi1>
    %171 = arith.select %170, %158, %14 : vector<8x16xi1>, vector<8x16xi32>
    %172 = vector.extract_strided_slice %168 {offsets = [0, 0], sizes = [1, 16], strides = [1, 1]} : vector<8x16xf32> to vector<1x16xf32>
    %173 = vector.broadcast %172 : vector<1x16xf32> to vector<8x16xf32>
    %174 = vector.broadcast %15 : vector<8x1xf32> to vector<8x16xf32>
    %175 = arith.addf %173, %174 : vector<8x16xf32>
    %c0_i32_23 = arith.constant 0 : i32
    %176 = vector.broadcast %c0_i32_23 : i32 to vector<8x16xi32>
    %177 = vector.extract_strided_slice %168 {offsets = [1, 0], sizes = [1, 16], strides = [1, 1]} : vector<8x16xf32> to vector<1x16xf32>
    %178 = vector.broadcast %177 : vector<1x16xf32> to vector<8x16xf32>
    %179 = vector.broadcast %16 : vector<8x1xf32> to vector<8x16xf32>
    %180 = arith.addf %178, %179 : vector<8x16xf32>
    %181 = arith.cmpf ogt, %180, %175 : vector<8x16xf32>
    %c1_i32_24 = arith.constant 1 : i32
    %182 = vector.broadcast %c1_i32_24 : i32 to vector<8x16xi32>
    %183 = arith.select %181, %182, %176 : vector<8x16xi1>, vector<8x16xi32>
    %184 = arith.maximumf %175, %180 : vector<8x16xf32>
    %185 = vector.extract_strided_slice %168 {offsets = [2, 0], sizes = [1, 16], strides = [1, 1]} : vector<8x16xf32> to vector<1x16xf32>
    %186 = vector.broadcast %185 : vector<1x16xf32> to vector<8x16xf32>
    %187 = vector.broadcast %17 : vector<8x1xf32> to vector<8x16xf32>
    %188 = arith.addf %186, %187 : vector<8x16xf32>
    %189 = arith.cmpf ogt, %188, %184 : vector<8x16xf32>
    %c2_i32_25 = arith.constant 2 : i32
    %190 = vector.broadcast %c2_i32_25 : i32 to vector<8x16xi32>
    %191 = arith.select %189, %190, %183 : vector<8x16xi1>, vector<8x16xi32>
    %192 = arith.maximumf %184, %188 : vector<8x16xf32>
    %193 = vector.extract_strided_slice %168 {offsets = [3, 0], sizes = [1, 16], strides = [1, 1]} : vector<8x16xf32> to vector<1x16xf32>
    %194 = vector.broadcast %193 : vector<1x16xf32> to vector<8x16xf32>
    %195 = vector.broadcast %18 : vector<8x1xf32> to vector<8x16xf32>
    %196 = arith.addf %194, %195 : vector<8x16xf32>
    %197 = arith.cmpf ogt, %196, %192 : vector<8x16xf32>
    %c3_i32_26 = arith.constant 3 : i32
    %198 = vector.broadcast %c3_i32_26 : i32 to vector<8x16xi32>
    %199 = arith.select %197, %198, %191 : vector<8x16xi1>, vector<8x16xi32>
    %200 = arith.maximumf %192, %196 : vector<8x16xf32>
    %201 = vector.extract_strided_slice %168 {offsets = [4, 0], sizes = [1, 16], strides = [1, 1]} : vector<8x16xf32> to vector<1x16xf32>
    %202 = vector.broadcast %201 : vector<1x16xf32> to vector<8x16xf32>
    %203 = vector.broadcast %19 : vector<8x1xf32> to vector<8x16xf32>
    %204 = arith.addf %202, %203 : vector<8x16xf32>
    %205 = arith.cmpf ogt, %204, %200 : vector<8x16xf32>
    %c4_i32_27 = arith.constant 4 : i32
    %206 = vector.broadcast %c4_i32_27 : i32 to vector<8x16xi32>
    %207 = arith.select %205, %206, %199 : vector<8x16xi1>, vector<8x16xi32>
    %208 = arith.maximumf %200, %204 : vector<8x16xf32>
    %209 = vector.extract_strided_slice %168 {offsets = [5, 0], sizes = [1, 16], strides = [1, 1]} : vector<8x16xf32> to vector<1x16xf32>
    %210 = vector.broadcast %209 : vector<1x16xf32> to vector<8x16xf32>
    %211 = vector.broadcast %20 : vector<8x1xf32> to vector<8x16xf32>
    %212 = arith.addf %210, %211 : vector<8x16xf32>
    %213 = arith.cmpf ogt, %212, %208 : vector<8x16xf32>
    %c5_i32_28 = arith.constant 5 : i32
    %214 = vector.broadcast %c5_i32_28 : i32 to vector<8x16xi32>
    %215 = arith.select %213, %214, %207 : vector<8x16xi1>, vector<8x16xi32>
    %216 = arith.maximumf %208, %212 : vector<8x16xf32>
    %217 = vector.extract_strided_slice %168 {offsets = [6, 0], sizes = [1, 16], strides = [1, 1]} : vector<8x16xf32> to vector<1x16xf32>
    %218 = vector.broadcast %217 : vector<1x16xf32> to vector<8x16xf32>
    %219 = vector.broadcast %21 : vector<8x1xf32> to vector<8x16xf32>
    %220 = arith.addf %218, %219 : vector<8x16xf32>
    %221 = arith.cmpf ogt, %220, %216 : vector<8x16xf32>
    %c6_i32_29 = arith.constant 6 : i32
    %222 = vector.broadcast %c6_i32_29 : i32 to vector<8x16xi32>
    %223 = arith.select %221, %222, %215 : vector<8x16xi1>, vector<8x16xi32>
    %224 = arith.maximumf %216, %220 : vector<8x16xf32>
    %225 = vector.extract_strided_slice %168 {offsets = [7, 0], sizes = [1, 16], strides = [1, 1]} : vector<8x16xf32> to vector<1x16xf32>
    %226 = vector.broadcast %225 : vector<1x16xf32> to vector<8x16xf32>
    %227 = vector.broadcast %22 : vector<8x1xf32> to vector<8x16xf32>
    %228 = arith.addf %226, %227 : vector<8x16xf32>
    %229 = arith.cmpf ogt, %228, %224 : vector<8x16xf32>
    %c7_i32_30 = arith.constant 7 : i32
    %230 = vector.broadcast %c7_i32_30 : i32 to vector<8x16xi32>
    %231 = arith.select %229, %230, %223 : vector<8x16xi1>, vector<8x16xi32>
    %232 = arith.maximumf %224, %228 : vector<8x16xf32>
    %c0_31 = arith.constant 0 : index
    %c3 = arith.constant 3 : index
    %c0_32 = arith.constant 0 : index
    %233 = vector.load %arg4[%c0_31, %c3, %c0_32] : memref<1x8x16xf32, #tpu.memory_space<vmem>>, vector<1x1x16xf32>
    %234 = vector.shape_cast %233 : vector<1x1x16xf32> to vector<1x16xf32>
    %cst_33 = arith.constant 0.000000e+00 : f32
    %235 = vector.broadcast %cst_33 : f32 to vector<1x16xf32>
    %236 = arith.cmpf ogt, %234, %235 : vector<1x16xf32>
    %237 = vector.extract_strided_slice %10 {offsets = [0, 48], sizes = [8, 16], strides = [1, 1]} : vector<8x128xf32> to vector<8x16xf32>
    %238 = arith.addf %232, %237 : vector<8x16xf32>
    %239 = vector.shape_cast %236 : vector<1x16xi1> to vector<1x16xi1>
    %240 = vector.broadcast %239 : vector<1x16xi1> to vector<8x16xi1>
    %241 = arith.select %240, %238, %168 : vector<8x16xi1>, vector<8x16xf32>
    %242 = vector.shape_cast %236 : vector<1x16xi1> to vector<1x16xi1>
    %243 = vector.broadcast %242 : vector<1x16xi1> to vector<8x16xi1>
    %244 = arith.select %243, %231, %14 : vector<8x16xi1>, vector<8x16xi32>
    %245 = vector.extract_strided_slice %241 {offsets = [0, 0], sizes = [1, 16], strides = [1, 1]} : vector<8x16xf32> to vector<1x16xf32>
    %246 = vector.broadcast %245 : vector<1x16xf32> to vector<8x16xf32>
    %247 = vector.broadcast %15 : vector<8x1xf32> to vector<8x16xf32>
    %248 = arith.addf %246, %247 : vector<8x16xf32>
    %c0_i32_34 = arith.constant 0 : i32
    %249 = vector.broadcast %c0_i32_34 : i32 to vector<8x16xi32>
    %250 = vector.extract_strided_slice %241 {offsets = [1, 0], sizes = [1, 16], strides = [1, 1]} : vector<8x16xf32> to vector<1x16xf32>
    %251 = vector.broadcast %250 : vector<1x16xf32> to vector<8x16xf32>
    %252 = vector.broadcast %16 : vector<8x1xf32> to vector<8x16xf32>
    %253 = arith.addf %251, %252 : vector<8x16xf32>
    %254 = arith.cmpf ogt, %253, %248 : vector<8x16xf32>
    %c1_i32_35 = arith.constant 1 : i32
    %255 = vector.broadcast %c1_i32_35 : i32 to vector<8x16xi32>
    %256 = arith.select %254, %255, %249 : vector<8x16xi1>, vector<8x16xi32>
    %257 = arith.maximumf %248, %253 : vector<8x16xf32>
    %258 = vector.extract_strided_slice %241 {offsets = [2, 0], sizes = [1, 16], strides = [1, 1]} : vector<8x16xf32> to vector<1x16xf32>
    %259 = vector.broadcast %258 : vector<1x16xf32> to vector<8x16xf32>
    %260 = vector.broadcast %17 : vector<8x1xf32> to vector<8x16xf32>
    %261 = arith.addf %259, %260 : vector<8x16xf32>
    %262 = arith.cmpf ogt, %261, %257 : vector<8x16xf32>
    %c2_i32_36 = arith.constant 2 : i32
    %263 = vector.broadcast %c2_i32_36 : i32 to vector<8x16xi32>
    %264 = arith.select %262, %263, %256 : vector<8x16xi1>, vector<8x16xi32>
    %265 = arith.maximumf %257, %261 : vector<8x16xf32>
    %266 = vector.extract_strided_slice %241 {offsets = [3, 0], sizes = [1, 16], strides = [1, 1]} : vector<8x16xf32> to vector<1x16xf32>
    %267 = vector.broadcast %266 : vector<1x16xf32> to vector<8x16xf32>
    %268 = vector.broadcast %18 : vector<8x1xf32> to vector<8x16xf32>
    %269 = arith.addf %267, %268 : vector<8x16xf32>
    %270 = arith.cmpf ogt, %269, %265 : vector<8x16xf32>
    %c3_i32_37 = arith.constant 3 : i32
    %271 = vector.broadcast %c3_i32_37 : i32 to vector<8x16xi32>
    %272 = arith.select %270, %271, %264 : vector<8x16xi1>, vector<8x16xi32>
    %273 = arith.maximumf %265, %269 : vector<8x16xf32>
    %274 = vector.extract_strided_slice %241 {offsets = [4, 0], sizes = [1, 16], strides = [1, 1]} : vector<8x16xf32> to vector<1x16xf32>
    %275 = vector.broadcast %274 : vector<1x16xf32> to vector<8x16xf32>
    %276 = vector.broadcast %19 : vector<8x1xf32> to vector<8x16xf32>
    %277 = arith.addf %275, %276 : vector<8x16xf32>
    %278 = arith.cmpf ogt, %277, %273 : vector<8x16xf32>
    %c4_i32_38 = arith.constant 4 : i32
    %279 = vector.broadcast %c4_i32_38 : i32 to vector<8x16xi32>
    %280 = arith.select %278, %279, %272 : vector<8x16xi1>, vector<8x16xi32>
    %281 = arith.maximumf %273, %277 : vector<8x16xf32>
    %282 = vector.extract_strided_slice %241 {offsets = [5, 0], sizes = [1, 16], strides = [1, 1]} : vector<8x16xf32> to vector<1x16xf32>
    %283 = vector.broadcast %282 : vector<1x16xf32> to vector<8x16xf32>
    %284 = vector.broadcast %20 : vector<8x1xf32> to vector<8x16xf32>
    %285 = arith.addf %283, %284 : vector<8x16xf32>
    %286 = arith.cmpf ogt, %285, %281 : vector<8x16xf32>
    %c5_i32_39 = arith.constant 5 : i32
    %287 = vector.broadcast %c5_i32_39 : i32 to vector<8x16xi32>
    %288 = arith.select %286, %287, %280 : vector<8x16xi1>, vector<8x16xi32>
    %289 = arith.maximumf %281, %285 : vector<8x16xf32>
    %290 = vector.extract_strided_slice %241 {offsets = [6, 0], sizes = [1, 16], strides = [1, 1]} : vector<8x16xf32> to vector<1x16xf32>
    %291 = vector.broadcast %290 : vector<1x16xf32> to vector<8x16xf32>
    %292 = vector.broadcast %21 : vector<8x1xf32> to vector<8x16xf32>
    %293 = arith.addf %291, %292 : vector<8x16xf32>
    %294 = arith.cmpf ogt, %293, %289 : vector<8x16xf32>
    %c6_i32_40 = arith.constant 6 : i32
    %295 = vector.broadcast %c6_i32_40 : i32 to vector<8x16xi32>
    %296 = arith.select %294, %295, %288 : vector<8x16xi1>, vector<8x16xi32>
    %297 = arith.maximumf %289, %293 : vector<8x16xf32>
    %298 = vector.extract_strided_slice %241 {offsets = [7, 0], sizes = [1, 16], strides = [1, 1]} : vector<8x16xf32> to vector<1x16xf32>
    %299 = vector.broadcast %298 : vector<1x16xf32> to vector<8x16xf32>
    %300 = vector.broadcast %22 : vector<8x1xf32> to vector<8x16xf32>
    %301 = arith.addf %299, %300 : vector<8x16xf32>
    %302 = arith.cmpf ogt, %301, %297 : vector<8x16xf32>
    %c7_i32_41 = arith.constant 7 : i32
    %303 = vector.broadcast %c7_i32_41 : i32 to vector<8x16xi32>
    %304 = arith.select %302, %303, %296 : vector<8x16xi1>, vector<8x16xi32>
    %305 = arith.maximumf %297, %301 : vector<8x16xf32>
    %c0_42 = arith.constant 0 : index
    %c4 = arith.constant 4 : index
    %c0_43 = arith.constant 0 : index
    %306 = vector.load %arg4[%c0_42, %c4, %c0_43] : memref<1x8x16xf32, #tpu.memory_space<vmem>>, vector<1x1x16xf32>
    %307 = vector.shape_cast %306 : vector<1x1x16xf32> to vector<1x16xf32>
    %cst_44 = arith.constant 0.000000e+00 : f32
    %308 = vector.broadcast %cst_44 : f32 to vector<1x16xf32>
    %309 = arith.cmpf ogt, %307, %308 : vector<1x16xf32>
    %310 = vector.extract_strided_slice %10 {offsets = [0, 64], sizes = [8, 16], strides = [1, 1]} : vector<8x128xf32> to vector<8x16xf32>
    %311 = arith.addf %305, %310 : vector<8x16xf32>
    %312 = vector.shape_cast %309 : vector<1x16xi1> to vector<1x16xi1>
    %313 = vector.broadcast %312 : vector<1x16xi1> to vector<8x16xi1>
    %314 = arith.select %313, %311, %241 : vector<8x16xi1>, vector<8x16xf32>
    %315 = vector.shape_cast %309 : vector<1x16xi1> to vector<1x16xi1>
    %316 = vector.broadcast %315 : vector<1x16xi1> to vector<8x16xi1>
    %317 = arith.select %316, %304, %14 : vector<8x16xi1>, vector<8x16xi32>
    %318 = vector.extract_strided_slice %314 {offsets = [0, 0], sizes = [1, 16], strides = [1, 1]} : vector<8x16xf32> to vector<1x16xf32>
    %319 = vector.broadcast %318 : vector<1x16xf32> to vector<8x16xf32>
    %320 = vector.broadcast %15 : vector<8x1xf32> to vector<8x16xf32>
    %321 = arith.addf %319, %320 : vector<8x16xf32>
    %c0_i32_45 = arith.constant 0 : i32
    %322 = vector.broadcast %c0_i32_45 : i32 to vector<8x16xi32>
    %323 = vector.extract_strided_slice %314 {offsets = [1, 0], sizes = [1, 16], strides = [1, 1]} : vector<8x16xf32> to vector<1x16xf32>
    %324 = vector.broadcast %323 : vector<1x16xf32> to vector<8x16xf32>
    %325 = vector.broadcast %16 : vector<8x1xf32> to vector<8x16xf32>
    %326 = arith.addf %324, %325 : vector<8x16xf32>
    %327 = arith.cmpf ogt, %326, %321 : vector<8x16xf32>
    %c1_i32_46 = arith.constant 1 : i32
    %328 = vector.broadcast %c1_i32_46 : i32 to vector<8x16xi32>
    %329 = arith.select %327, %328, %322 : vector<8x16xi1>, vector<8x16xi32>
    %330 = arith.maximumf %321, %326 : vector<8x16xf32>
    %331 = vector.extract_strided_slice %314 {offsets = [2, 0], sizes = [1, 16], strides = [1, 1]} : vector<8x16xf32> to vector<1x16xf32>
    %332 = vector.broadcast %331 : vector<1x16xf32> to vector<8x16xf32>
    %333 = vector.broadcast %17 : vector<8x1xf32> to vector<8x16xf32>
    %334 = arith.addf %332, %333 : vector<8x16xf32>
    %335 = arith.cmpf ogt, %334, %330 : vector<8x16xf32>
    %c2_i32_47 = arith.constant 2 : i32
    %336 = vector.broadcast %c2_i32_47 : i32 to vector<8x16xi32>
    %337 = arith.select %335, %336, %329 : vector<8x16xi1>, vector<8x16xi32>
    %338 = arith.maximumf %330, %334 : vector<8x16xf32>
    %339 = vector.extract_strided_slice %314 {offsets = [3, 0], sizes = [1, 16], strides = [1, 1]} : vector<8x16xf32> to vector<1x16xf32>
    %340 = vector.broadcast %339 : vector<1x16xf32> to vector<8x16xf32>
    %341 = vector.broadcast %18 : vector<8x1xf32> to vector<8x16xf32>
    %342 = arith.addf %340, %341 : vector<8x16xf32>
    %343 = arith.cmpf ogt, %342, %338 : vector<8x16xf32>
    %c3_i32_48 = arith.constant 3 : i32
    %344 = vector.broadcast %c3_i32_48 : i32 to vector<8x16xi32>
    %345 = arith.select %343, %344, %337 : vector<8x16xi1>, vector<8x16xi32>
    %346 = arith.maximumf %338, %342 : vector<8x16xf32>
    %347 = vector.extract_strided_slice %314 {offsets = [4, 0], sizes = [1, 16], strides = [1, 1]} : vector<8x16xf32> to vector<1x16xf32>
    %348 = vector.broadcast %347 : vector<1x16xf32> to vector<8x16xf32>
    %349 = vector.broadcast %19 : vector<8x1xf32> to vector<8x16xf32>
    %350 = arith.addf %348, %349 : vector<8x16xf32>
    %351 = arith.cmpf ogt, %350, %346 : vector<8x16xf32>
    %c4_i32_49 = arith.constant 4 : i32
    %352 = vector.broadcast %c4_i32_49 : i32 to vector<8x16xi32>
    %353 = arith.select %351, %352, %345 : vector<8x16xi1>, vector<8x16xi32>
    %354 = arith.maximumf %346, %350 : vector<8x16xf32>
    %355 = vector.extract_strided_slice %314 {offsets = [5, 0], sizes = [1, 16], strides = [1, 1]} : vector<8x16xf32> to vector<1x16xf32>
    %356 = vector.broadcast %355 : vector<1x16xf32> to vector<8x16xf32>
    %357 = vector.broadcast %20 : vector<8x1xf32> to vector<8x16xf32>
    %358 = arith.addf %356, %357 : vector<8x16xf32>
    %359 = arith.cmpf ogt, %358, %354 : vector<8x16xf32>
    %c5_i32_50 = arith.constant 5 : i32
    %360 = vector.broadcast %c5_i32_50 : i32 to vector<8x16xi32>
    %361 = arith.select %359, %360, %353 : vector<8x16xi1>, vector<8x16xi32>
    %362 = arith.maximumf %354, %358 : vector<8x16xf32>
    %363 = vector.extract_strided_slice %314 {offsets = [6, 0], sizes = [1, 16], strides = [1, 1]} : vector<8x16xf32> to vector<1x16xf32>
    %364 = vector.broadcast %363 : vector<1x16xf32> to vector<8x16xf32>
    %365 = vector.broadcast %21 : vector<8x1xf32> to vector<8x16xf32>
    %366 = arith.addf %364, %365 : vector<8x16xf32>
    %367 = arith.cmpf ogt, %366, %362 : vector<8x16xf32>
    %c6_i32_51 = arith.constant 6 : i32
    %368 = vector.broadcast %c6_i32_51 : i32 to vector<8x16xi32>
    %369 = arith.select %367, %368, %361 : vector<8x16xi1>, vector<8x16xi32>
    %370 = arith.maximumf %362, %366 : vector<8x16xf32>
    %371 = vector.extract_strided_slice %314 {offsets = [7, 0], sizes = [1, 16], strides = [1, 1]} : vector<8x16xf32> to vector<1x16xf32>
    %372 = vector.broadcast %371 : vector<1x16xf32> to vector<8x16xf32>
    %373 = vector.broadcast %22 : vector<8x1xf32> to vector<8x16xf32>
    %374 = arith.addf %372, %373 : vector<8x16xf32>
    %375 = arith.cmpf ogt, %374, %370 : vector<8x16xf32>
    %c7_i32_52 = arith.constant 7 : i32
    %376 = vector.broadcast %c7_i32_52 : i32 to vector<8x16xi32>
    %377 = arith.select %375, %376, %369 : vector<8x16xi1>, vector<8x16xi32>
    %378 = arith.maximumf %370, %374 : vector<8x16xf32>
    %c0_53 = arith.constant 0 : index
    %c5 = arith.constant 5 : index
    %c0_54 = arith.constant 0 : index
    %379 = vector.load %arg4[%c0_53, %c5, %c0_54] : memref<1x8x16xf32, #tpu.memory_space<vmem>>, vector<1x1x16xf32>
    %380 = vector.shape_cast %379 : vector<1x1x16xf32> to vector<1x16xf32>
    %cst_55 = arith.constant 0.000000e+00 : f32
    %381 = vector.broadcast %cst_55 : f32 to vector<1x16xf32>
    %382 = arith.cmpf ogt, %380, %381 : vector<1x16xf32>
    %383 = vector.extract_strided_slice %10 {offsets = [0, 80], sizes = [8, 16], strides = [1, 1]} : vector<8x128xf32> to vector<8x16xf32>
    %384 = arith.addf %378, %383 : vector<8x16xf32>
    %385 = vector.shape_cast %382 : vector<1x16xi1> to vector<1x16xi1>
    %386 = vector.broadcast %385 : vector<1x16xi1> to vector<8x16xi1>
    %387 = arith.select %386, %384, %314 : vector<8x16xi1>, vector<8x16xf32>
    %388 = vector.shape_cast %382 : vector<1x16xi1> to vector<1x16xi1>
    %389 = vector.broadcast %388 : vector<1x16xi1> to vector<8x16xi1>
    %390 = arith.select %389, %377, %14 : vector<8x16xi1>, vector<8x16xi32>
    %391 = vector.extract_strided_slice %387 {offsets = [0, 0], sizes = [1, 16], strides = [1, 1]} : vector<8x16xf32> to vector<1x16xf32>
    %392 = vector.broadcast %391 : vector<1x16xf32> to vector<8x16xf32>
    %393 = vector.broadcast %15 : vector<8x1xf32> to vector<8x16xf32>
    %394 = arith.addf %392, %393 : vector<8x16xf32>
    %c0_i32_56 = arith.constant 0 : i32
    %395 = vector.broadcast %c0_i32_56 : i32 to vector<8x16xi32>
    %396 = vector.extract_strided_slice %387 {offsets = [1, 0], sizes = [1, 16], strides = [1, 1]} : vector<8x16xf32> to vector<1x16xf32>
    %397 = vector.broadcast %396 : vector<1x16xf32> to vector<8x16xf32>
    %398 = vector.broadcast %16 : vector<8x1xf32> to vector<8x16xf32>
    %399 = arith.addf %397, %398 : vector<8x16xf32>
    %400 = arith.cmpf ogt, %399, %394 : vector<8x16xf32>
    %c1_i32_57 = arith.constant 1 : i32
    %401 = vector.broadcast %c1_i32_57 : i32 to vector<8x16xi32>
    %402 = arith.select %400, %401, %395 : vector<8x16xi1>, vector<8x16xi32>
    %403 = arith.maximumf %394, %399 : vector<8x16xf32>
    %404 = vector.extract_strided_slice %387 {offsets = [2, 0], sizes = [1, 16], strides = [1, 1]} : vector<8x16xf32> to vector<1x16xf32>
    %405 = vector.broadcast %404 : vector<1x16xf32> to vector<8x16xf32>
    %406 = vector.broadcast %17 : vector<8x1xf32> to vector<8x16xf32>
    %407 = arith.addf %405, %406 : vector<8x16xf32>
    %408 = arith.cmpf ogt, %407, %403 : vector<8x16xf32>
    %c2_i32_58 = arith.constant 2 : i32
    %409 = vector.broadcast %c2_i32_58 : i32 to vector<8x16xi32>
    %410 = arith.select %408, %409, %402 : vector<8x16xi1>, vector<8x16xi32>
    %411 = arith.maximumf %403, %407 : vector<8x16xf32>
    %412 = vector.extract_strided_slice %387 {offsets = [3, 0], sizes = [1, 16], strides = [1, 1]} : vector<8x16xf32> to vector<1x16xf32>
    %413 = vector.broadcast %412 : vector<1x16xf32> to vector<8x16xf32>
    %414 = vector.broadcast %18 : vector<8x1xf32> to vector<8x16xf32>
    %415 = arith.addf %413, %414 : vector<8x16xf32>
    %416 = arith.cmpf ogt, %415, %411 : vector<8x16xf32>
    %c3_i32_59 = arith.constant 3 : i32
    %417 = vector.broadcast %c3_i32_59 : i32 to vector<8x16xi32>
    %418 = arith.select %416, %417, %410 : vector<8x16xi1>, vector<8x16xi32>
    %419 = arith.maximumf %411, %415 : vector<8x16xf32>
    %420 = vector.extract_strided_slice %387 {offsets = [4, 0], sizes = [1, 16], strides = [1, 1]} : vector<8x16xf32> to vector<1x16xf32>
    %421 = vector.broadcast %420 : vector<1x16xf32> to vector<8x16xf32>
    %422 = vector.broadcast %19 : vector<8x1xf32> to vector<8x16xf32>
    %423 = arith.addf %421, %422 : vector<8x16xf32>
    %424 = arith.cmpf ogt, %423, %419 : vector<8x16xf32>
    %c4_i32_60 = arith.constant 4 : i32
    %425 = vector.broadcast %c4_i32_60 : i32 to vector<8x16xi32>
    %426 = arith.select %424, %425, %418 : vector<8x16xi1>, vector<8x16xi32>
    %427 = arith.maximumf %419, %423 : vector<8x16xf32>
    %428 = vector.extract_strided_slice %387 {offsets = [5, 0], sizes = [1, 16], strides = [1, 1]} : vector<8x16xf32> to vector<1x16xf32>
    %429 = vector.broadcast %428 : vector<1x16xf32> to vector<8x16xf32>
    %430 = vector.broadcast %20 : vector<8x1xf32> to vector<8x16xf32>
    %431 = arith.addf %429, %430 : vector<8x16xf32>
    %432 = arith.cmpf ogt, %431, %427 : vector<8x16xf32>
    %c5_i32_61 = arith.constant 5 : i32
    %433 = vector.broadcast %c5_i32_61 : i32 to vector<8x16xi32>
    %434 = arith.select %432, %433, %426 : vector<8x16xi1>, vector<8x16xi32>
    %435 = arith.maximumf %427, %431 : vector<8x16xf32>
    %436 = vector.extract_strided_slice %387 {offsets = [6, 0], sizes = [1, 16], strides = [1, 1]} : vector<8x16xf32> to vector<1x16xf32>
    %437 = vector.broadcast %436 : vector<1x16xf32> to vector<8x16xf32>
    %438 = vector.broadcast %21 : vector<8x1xf32> to vector<8x16xf32>
    %439 = arith.addf %437, %438 : vector<8x16xf32>
    %440 = arith.cmpf ogt, %439, %435 : vector<8x16xf32>
    %c6_i32_62 = arith.constant 6 : i32
    %441 = vector.broadcast %c6_i32_62 : i32 to vector<8x16xi32>
    %442 = arith.select %440, %441, %434 : vector<8x16xi1>, vector<8x16xi32>
    %443 = arith.maximumf %435, %439 : vector<8x16xf32>
    %444 = vector.extract_strided_slice %387 {offsets = [7, 0], sizes = [1, 16], strides = [1, 1]} : vector<8x16xf32> to vector<1x16xf32>
    %445 = vector.broadcast %444 : vector<1x16xf32> to vector<8x16xf32>
    %446 = vector.broadcast %22 : vector<8x1xf32> to vector<8x16xf32>
    %447 = arith.addf %445, %446 : vector<8x16xf32>
    %448 = arith.cmpf ogt, %447, %443 : vector<8x16xf32>
    %c7_i32_63 = arith.constant 7 : i32
    %449 = vector.broadcast %c7_i32_63 : i32 to vector<8x16xi32>
    %450 = arith.select %448, %449, %442 : vector<8x16xi1>, vector<8x16xi32>
    %451 = arith.maximumf %443, %447 : vector<8x16xf32>
    %c0_64 = arith.constant 0 : index
    %c6 = arith.constant 6 : index
    %c0_65 = arith.constant 0 : index
    %452 = vector.load %arg4[%c0_64, %c6, %c0_65] : memref<1x8x16xf32, #tpu.memory_space<vmem>>, vector<1x1x16xf32>
    %453 = vector.shape_cast %452 : vector<1x1x16xf32> to vector<1x16xf32>
    %cst_66 = arith.constant 0.000000e+00 : f32
    %454 = vector.broadcast %cst_66 : f32 to vector<1x16xf32>
    %455 = arith.cmpf ogt, %453, %454 : vector<1x16xf32>
    %456 = vector.extract_strided_slice %10 {offsets = [0, 96], sizes = [8, 16], strides = [1, 1]} : vector<8x128xf32> to vector<8x16xf32>
    %457 = arith.addf %451, %456 : vector<8x16xf32>
    %458 = vector.shape_cast %455 : vector<1x16xi1> to vector<1x16xi1>
    %459 = vector.broadcast %458 : vector<1x16xi1> to vector<8x16xi1>
    %460 = arith.select %459, %457, %387 : vector<8x16xi1>, vector<8x16xf32>
    %461 = vector.shape_cast %455 : vector<1x16xi1> to vector<1x16xi1>
    %462 = vector.broadcast %461 : vector<1x16xi1> to vector<8x16xi1>
    %463 = arith.select %462, %450, %14 : vector<8x16xi1>, vector<8x16xi32>
    %464 = vector.extract_strided_slice %460 {offsets = [0, 0], sizes = [1, 16], strides = [1, 1]} : vector<8x16xf32> to vector<1x16xf32>
    %465 = vector.broadcast %464 : vector<1x16xf32> to vector<8x16xf32>
    %466 = vector.broadcast %15 : vector<8x1xf32> to vector<8x16xf32>
    %467 = arith.addf %465, %466 : vector<8x16xf32>
    %c0_i32_67 = arith.constant 0 : i32
    %468 = vector.broadcast %c0_i32_67 : i32 to vector<8x16xi32>
    %469 = vector.extract_strided_slice %460 {offsets = [1, 0], sizes = [1, 16], strides = [1, 1]} : vector<8x16xf32> to vector<1x16xf32>
    %470 = vector.broadcast %469 : vector<1x16xf32> to vector<8x16xf32>
    %471 = vector.broadcast %16 : vector<8x1xf32> to vector<8x16xf32>
    %472 = arith.addf %470, %471 : vector<8x16xf32>
    %473 = arith.cmpf ogt, %472, %467 : vector<8x16xf32>
    %c1_i32_68 = arith.constant 1 : i32
    %474 = vector.broadcast %c1_i32_68 : i32 to vector<8x16xi32>
    %475 = arith.select %473, %474, %468 : vector<8x16xi1>, vector<8x16xi32>
    %476 = arith.maximumf %467, %472 : vector<8x16xf32>
    %477 = vector.extract_strided_slice %460 {offsets = [2, 0], sizes = [1, 16], strides = [1, 1]} : vector<8x16xf32> to vector<1x16xf32>
    %478 = vector.broadcast %477 : vector<1x16xf32> to vector<8x16xf32>
    %479 = vector.broadcast %17 : vector<8x1xf32> to vector<8x16xf32>
    %480 = arith.addf %478, %479 : vector<8x16xf32>
    %481 = arith.cmpf ogt, %480, %476 : vector<8x16xf32>
    %c2_i32_69 = arith.constant 2 : i32
    %482 = vector.broadcast %c2_i32_69 : i32 to vector<8x16xi32>
    %483 = arith.select %481, %482, %475 : vector<8x16xi1>, vector<8x16xi32>
    %484 = arith.maximumf %476, %480 : vector<8x16xf32>
    %485 = vector.extract_strided_slice %460 {offsets = [3, 0], sizes = [1, 16], strides = [1, 1]} : vector<8x16xf32> to vector<1x16xf32>
    %486 = vector.broadcast %485 : vector<1x16xf32> to vector<8x16xf32>
    %487 = vector.broadcast %18 : vector<8x1xf32> to vector<8x16xf32>
    %488 = arith.addf %486, %487 : vector<8x16xf32>
    %489 = arith.cmpf ogt, %488, %484 : vector<8x16xf32>
    %c3_i32_70 = arith.constant 3 : i32
    %490 = vector.broadcast %c3_i32_70 : i32 to vector<8x16xi32>
    %491 = arith.select %489, %490, %483 : vector<8x16xi1>, vector<8x16xi32>
    %492 = arith.maximumf %484, %488 : vector<8x16xf32>
    %493 = vector.extract_strided_slice %460 {offsets = [4, 0], sizes = [1, 16], strides = [1, 1]} : vector<8x16xf32> to vector<1x16xf32>
    %494 = vector.broadcast %493 : vector<1x16xf32> to vector<8x16xf32>
    %495 = vector.broadcast %19 : vector<8x1xf32> to vector<8x16xf32>
    %496 = arith.addf %494, %495 : vector<8x16xf32>
    %497 = arith.cmpf ogt, %496, %492 : vector<8x16xf32>
    %c4_i32_71 = arith.constant 4 : i32
    %498 = vector.broadcast %c4_i32_71 : i32 to vector<8x16xi32>
    %499 = arith.select %497, %498, %491 : vector<8x16xi1>, vector<8x16xi32>
    %500 = arith.maximumf %492, %496 : vector<8x16xf32>
    %501 = vector.extract_strided_slice %460 {offsets = [5, 0], sizes = [1, 16], strides = [1, 1]} : vector<8x16xf32> to vector<1x16xf32>
    %502 = vector.broadcast %501 : vector<1x16xf32> to vector<8x16xf32>
    %503 = vector.broadcast %20 : vector<8x1xf32> to vector<8x16xf32>
    %504 = arith.addf %502, %503 : vector<8x16xf32>
    %505 = arith.cmpf ogt, %504, %500 : vector<8x16xf32>
    %c5_i32_72 = arith.constant 5 : i32
    %506 = vector.broadcast %c5_i32_72 : i32 to vector<8x16xi32>
    %507 = arith.select %505, %506, %499 : vector<8x16xi1>, vector<8x16xi32>
    %508 = arith.maximumf %500, %504 : vector<8x16xf32>
    %509 = vector.extract_strided_slice %460 {offsets = [6, 0], sizes = [1, 16], strides = [1, 1]} : vector<8x16xf32> to vector<1x16xf32>
    %510 = vector.broadcast %509 : vector<1x16xf32> to vector<8x16xf32>
    %511 = vector.broadcast %21 : vector<8x1xf32> to vector<8x16xf32>
    %512 = arith.addf %510, %511 : vector<8x16xf32>
    %513 = arith.cmpf ogt, %512, %508 : vector<8x16xf32>
    %c6_i32_73 = arith.constant 6 : i32
    %514 = vector.broadcast %c6_i32_73 : i32 to vector<8x16xi32>
    %515 = arith.select %513, %514, %507 : vector<8x16xi1>, vector<8x16xi32>
    %516 = arith.maximumf %508, %512 : vector<8x16xf32>
    %517 = vector.extract_strided_slice %460 {offsets = [7, 0], sizes = [1, 16], strides = [1, 1]} : vector<8x16xf32> to vector<1x16xf32>
    %518 = vector.broadcast %517 : vector<1x16xf32> to vector<8x16xf32>
    %519 = vector.broadcast %22 : vector<8x1xf32> to vector<8x16xf32>
    %520 = arith.addf %518, %519 : vector<8x16xf32>
    %521 = arith.cmpf ogt, %520, %516 : vector<8x16xf32>
    %c7_i32_74 = arith.constant 7 : i32
    %522 = vector.broadcast %c7_i32_74 : i32 to vector<8x16xi32>
    %523 = arith.select %521, %522, %515 : vector<8x16xi1>, vector<8x16xi32>
    %524 = arith.maximumf %516, %520 : vector<8x16xf32>
    %c0_75 = arith.constant 0 : index
    %c7 = arith.constant 7 : index
    %c0_76 = arith.constant 0 : index
    %525 = vector.load %arg4[%c0_75, %c7, %c0_76] : memref<1x8x16xf32, #tpu.memory_space<vmem>>, vector<1x1x16xf32>
    %526 = vector.shape_cast %525 : vector<1x1x16xf32> to vector<1x16xf32>
    %cst_77 = arith.constant 0.000000e+00 : f32
    %527 = vector.broadcast %cst_77 : f32 to vector<1x16xf32>
    %528 = arith.cmpf ogt, %526, %527 : vector<1x16xf32>
    %529 = vector.extract_strided_slice %10 {offsets = [0, 112], sizes = [8, 16], strides = [1, 1]} : vector<8x128xf32> to vector<8x16xf32>
    %530 = arith.addf %524, %529 : vector<8x16xf32>
    %531 = vector.shape_cast %528 : vector<1x16xi1> to vector<1x16xi1>
    %532 = vector.broadcast %531 : vector<1x16xi1> to vector<8x16xi1>
    %533 = arith.select %532, %530, %460 : vector<8x16xi1>, vector<8x16xf32>
    %534 = vector.shape_cast %528 : vector<1x16xi1> to vector<1x16xi1>
    %535 = vector.broadcast %534 : vector<1x16xi1> to vector<8x16xi1>
    %536 = arith.select %535, %523, %14 : vector<8x16xi1>, vector<8x16xi32>
    %537 = vector.broadcast %4 : vector<8x1xf32> to vector<8x16xf32>
    %538 = arith.addf %533, %537 : vector<8x16xf32>
    %cst_78 = arith.constant dense<0xFF800000> : vector<16xf32>
    %539 = vector.multi_reduction <maximumf>, %538, %cst_78 [0] : vector<8x16xf32> to vector<16xf32>
    %540 = vector.shape_cast %539 : vector<16xf32> to vector<1x16xf32>
    %541 = vector.broadcast %540 : vector<1x16xf32> to vector<8x16xf32>
    %542 = arith.cmpf oeq, %538, %541 : vector<8x16xf32>
    %c8_i32 = arith.constant 8 : i32
    %543 = vector.broadcast %c8_i32 : i32 to vector<8x16xi32>
    %544 = arith.select %542, %14, %543 : vector<8x16xi1>, vector<8x16xi32>
    %cst_79 = arith.constant dense<2147483647> : vector<16xi32>
    %545 = vector.multi_reduction <minsi>, %544, %cst_79 [0] : vector<8x16xi32> to vector<16xi32>
    %546 = vector.shape_cast %545 : vector<16xi32> to vector<1x16xi32>
    %c0_80 = arith.constant 0 : index
    %c0_81 = arith.constant 0 : index
    %c112 = arith.constant 112 : index
    %547 = vector.load %arg6[%c0_80, %c0_81, %c112] : memref<1x1x128xi32, #tpu.memory_space<vmem>>, vector<1x1x16xi32>
    %548 = vector.shape_cast %547 : vector<1x1x16xi32> to vector<1x16xi32>
    %549 = vector.shape_cast %546 : vector<1x16xi32> to vector<1x1x16xi32>
    tpu.vector_store %arg6[%c0_80, %c0_81, %c112], %549 {strides = array<i32>} : memref<1x1x128xi32, #tpu.memory_space<vmem>>, vector<1x1x16xi32>,
    %550 = vector.broadcast %546 : vector<1x16xi32> to vector<8x16xi32>
    %551 = arith.cmpi eq, %14, %550 : vector<8x16xi32>
    %c0_i32_82 = arith.constant 0 : i32
    %552 = vector.broadcast %c0_i32_82 : i32 to vector<8x16xi32>
    %553 = arith.select %551, %536, %552 : vector<8x16xi1>, vector<8x16xi32>
    %cst_83 = arith.constant dense<0> : vector<16xi32>
    %554 = vector.multi_reduction <add>, %553, %cst_83 [0] : vector<8x16xi32> to vector<16xi32>
    %555 = vector.shape_cast %554 : vector<16xi32> to vector<1x16xi32>
    %c0_84 = arith.constant 0 : index
    %c0_85 = arith.constant 0 : index
    %c96 = arith.constant 96 : index
    %556 = vector.load %arg6[%c0_84, %c0_85, %c96] : memref<1x1x128xi32, #tpu.memory_space<vmem>>, vector<1x1x16xi32>
    %557 = vector.shape_cast %556 : vector<1x1x16xi32> to vector<1x16xi32>
    %558 = vector.shape_cast %555 : vector<1x16xi32> to vector<1x1x16xi32>
    tpu.vector_store %arg6[%c0_84, %c0_85, %c96], %558 {strides = array<i32>} : memref<1x1x128xi32, #tpu.memory_space<vmem>>, vector<1x1x16xi32>,
    %559 = vector.broadcast %555 : vector<1x16xi32> to vector<8x16xi32>
    %560 = arith.cmpi eq, %14, %559 : vector<8x16xi32>
    %c0_i32_86 = arith.constant 0 : i32
    %561 = vector.broadcast %c0_i32_86 : i32 to vector<8x16xi32>
    %562 = arith.select %560, %463, %561 : vector<8x16xi1>, vector<8x16xi32>
    %cst_87 = arith.constant dense<0> : vector<16xi32>
    %563 = vector.multi_reduction <add>, %562, %cst_87 [0] : vector<8x16xi32> to vector<16xi32>
    %564 = vector.shape_cast %563 : vector<16xi32> to vector<1x16xi32>
    %c0_88 = arith.constant 0 : index
    %c0_89 = arith.constant 0 : index
    %c80 = arith.constant 80 : index
    %565 = vector.load %arg6[%c0_88, %c0_89, %c80] : memref<1x1x128xi32, #tpu.memory_space<vmem>>, vector<1x1x16xi32>
    %566 = vector.shape_cast %565 : vector<1x1x16xi32> to vector<1x16xi32>
    %567 = vector.shape_cast %564 : vector<1x16xi32> to vector<1x1x16xi32>
    tpu.vector_store %arg6[%c0_88, %c0_89, %c80], %567 {strides = array<i32>} : memref<1x1x128xi32, #tpu.memory_space<vmem>>, vector<1x1x16xi32>,
    %568 = vector.broadcast %564 : vector<1x16xi32> to vector<8x16xi32>
    %569 = arith.cmpi eq, %14, %568 : vector<8x16xi32>
    %c0_i32_90 = arith.constant 0 : i32
    %570 = vector.broadcast %c0_i32_90 : i32 to vector<8x16xi32>
    %571 = arith.select %569, %390, %570 : vector<8x16xi1>, vector<8x16xi32>
    %cst_91 = arith.constant dense<0> : vector<16xi32>
    %572 = vector.multi_reduction <add>, %571, %cst_91 [0] : vector<8x16xi32> to vector<16xi32>
    %573 = vector.shape_cast %572 : vector<16xi32> to vector<1x16xi32>
    %c0_92 = arith.constant 0 : index
    %c0_93 = arith.constant 0 : index
    %c64 = arith.constant 64 : index
    %574 = vector.load %arg6[%c0_92, %c0_93, %c64] : memref<1x1x128xi32, #tpu.memory_space<vmem>>, vector<1x1x16xi32>
    %575 = vector.shape_cast %574 : vector<1x1x16xi32> to vector<1x16xi32>
    %576 = vector.shape_cast %573 : vector<1x16xi32> to vector<1x1x16xi32>
    tpu.vector_store %arg6[%c0_92, %c0_93, %c64], %576 {strides = array<i32>} : memref<1x1x128xi32, #tpu.memory_space<vmem>>, vector<1x1x16xi32>,
    %577 = vector.broadcast %573 : vector<1x16xi32> to vector<8x16xi32>
    %578 = arith.cmpi eq, %14, %577 : vector<8x16xi32>
    %c0_i32_94 = arith.constant 0 : i32
    %579 = vector.broadcast %c0_i32_94 : i32 to vector<8x16xi32>
    %580 = arith.select %578, %317, %579 : vector<8x16xi1>, vector<8x16xi32>
    %cst_95 = arith.constant dense<0> : vector<16xi32>
    %581 = vector.multi_reduction <add>, %580, %cst_95 [0] : vector<8x16xi32> to vector<16xi32>
    %582 = vector.shape_cast %581 : vector<16xi32> to vector<1x16xi32>
    %c0_96 = arith.constant 0 : index
    %c0_97 = arith.constant 0 : index
    %c48 = arith.constant 48 : index
    %583 = vector.load %arg6[%c0_96, %c0_97, %c48] : memref<1x1x128xi32, #tpu.memory_space<vmem>>, vector<1x1x16xi32>
    %584 = vector.shape_cast %583 : vector<1x1x16xi32> to vector<1x16xi32>
    %585 = vector.shape_cast %582 : vector<1x16xi32> to vector<1x1x16xi32>
    tpu.vector_store %arg6[%c0_96, %c0_97, %c48], %585 {strides = array<i32>} : memref<1x1x128xi32, #tpu.memory_space<vmem>>, vector<1x1x16xi32>,
    %586 = vector.broadcast %582 : vector<1x16xi32> to vector<8x16xi32>
    %587 = arith.cmpi eq, %14, %586 : vector<8x16xi32>
    %c0_i32_98 = arith.constant 0 : i32
    %588 = vector.broadcast %c0_i32_98 : i32 to vector<8x16xi32>
    %589 = arith.select %587, %244, %588 : vector<8x16xi1>, vector<8x16xi32>
    %cst_99 = arith.constant dense<0> : vector<16xi32>
    %590 = vector.multi_reduction <add>, %589, %cst_99 [0] : vector<8x16xi32> to vector<16xi32>
    %591 = vector.shape_cast %590 : vector<16xi32> to vector<1x16xi32>
    %c0_100 = arith.constant 0 : index
    %c0_101 = arith.constant 0 : index
    %c32 = arith.constant 32 : index
    %592 = vector.load %arg6[%c0_100, %c0_101, %c32] : memref<1x1x128xi32, #tpu.memory_space<vmem>>, vector<1x1x16xi32>
    %593 = vector.shape_cast %592 : vector<1x1x16xi32> to vector<1x16xi32>
    %594 = vector.shape_cast %591 : vector<1x16xi32> to vector<1x1x16xi32>
    tpu.vector_store %arg6[%c0_100, %c0_101, %c32], %594 {strides = array<i32>} : memref<1x1x128xi32, #tpu.memory_space<vmem>>, vector<1x1x16xi32>,
    %595 = vector.broadcast %591 : vector<1x16xi32> to vector<8x16xi32>
    %596 = arith.cmpi eq, %14, %595 : vector<8x16xi32>
    %c0_i32_102 = arith.constant 0 : i32
    %597 = vector.broadcast %c0_i32_102 : i32 to vector<8x16xi32>
    %598 = arith.select %596, %171, %597 : vector<8x16xi1>, vector<8x16xi32>
    %cst_103 = arith.constant dense<0> : vector<16xi32>
    %599 = vector.multi_reduction <add>, %598, %cst_103 [0] : vector<8x16xi32> to vector<16xi32>
    %600 = vector.shape_cast %599 : vector<16xi32> to vector<1x16xi32>
    %c0_104 = arith.constant 0 : index
    %c0_105 = arith.constant 0 : index
    %c16 = arith.constant 16 : index
    %601 = vector.load %arg6[%c0_104, %c0_105, %c16] : memref<1x1x128xi32, #tpu.memory_space<vmem>>, vector<1x1x16xi32>
    %602 = vector.shape_cast %601 : vector<1x1x16xi32> to vector<1x16xi32>
    %603 = vector.shape_cast %600 : vector<1x16xi32> to vector<1x1x16xi32>
    tpu.vector_store %arg6[%c0_104, %c0_105, %c16], %603 {strides = array<i32>} : memref<1x1x128xi32, #tpu.memory_space<vmem>>, vector<1x1x16xi32>,
    %604 = vector.broadcast %600 : vector<1x16xi32> to vector<8x16xi32>
    %605 = arith.cmpi eq, %14, %604 : vector<8x16xi32>
    %c0_i32_106 = arith.constant 0 : i32
    %606 = vector.broadcast %c0_i32_106 : i32 to vector<8x16xi32>
    %607 = arith.select %605, %98, %606 : vector<8x16xi1>, vector<8x16xi32>
    %cst_107 = arith.constant dense<0> : vector<16xi32>
    %608 = vector.multi_reduction <add>, %607, %cst_107 [0] : vector<8x16xi32> to vector<16xi32>
    %609 = vector.shape_cast %608 : vector<16xi32> to vector<1x16xi32>
    %c0_108 = arith.constant 0 : index
    %c0_109 = arith.constant 0 : index
    %c0_110 = arith.constant 0 : index
    %610 = vector.load %arg6[%c0_108, %c0_109, %c0_110] : memref<1x1x128xi32, #tpu.memory_space<vmem>>, vector<1x1x16xi32>
    %611 = vector.shape_cast %610 : vector<1x1x16xi32> to vector<1x16xi32>
    %612 = vector.shape_cast %609 : vector<1x16xi32> to vector<1x1x16xi32>
    tpu.vector_store %arg6[%c0_108, %c0_109, %c0_110], %612 {strides = array<i32>} : memref<1x1x128xi32, #tpu.memory_space<vmem>>, vector<1x1x16xi32>,
    return
  }
  func.func @transform_0(%arg0: i32) -> (i32, i32, i32) {
    %c0_i32 = arith.constant 0 : i32
    %c0_i32_0 = arith.constant 0 : i32
    %c0_i32_1 = arith.constant 0 : i32
    return %arg0, %c0_i32, %c0_i32_0 : i32, i32, i32
  }
  func.func @transform_1(%arg0: i32) -> (i32, i32) {
    %c0_i32 = arith.constant 0 : i32
    %c0_i32_0 = arith.constant 0 : i32
    %c0_i32_1 = arith.constant 0 : i32
    return %c0_i32, %c0_i32_0 : i32, i32
  }
  func.func @transform_2(%arg0: i32) -> (i32, i32) {
    %c0_i32 = arith.constant 0 : i32
    %c0_i32_0 = arith.constant 0 : i32
    %c0_i32_1 = arith.constant 0 : i32
    return %c0_i32, %c0_i32_0 : i32, i32
  }
  func.func @transform_3(%arg0: i32) -> (i32, i32, i32) {
    %c0_i32 = arith.constant 0 : i32
    %c0_i32_0 = arith.constant 0 : i32
    %c0_i32_1 = arith.constant 0 : i32
    return %arg0, %c0_i32, %c0_i32_0 : i32, i32, i32
  }
  func.func @transform_4(%arg0: i32) -> (i32, i32, i32) {
    %c0_i32 = arith.constant 0 : i32
    %c0_i32_0 = arith.constant 0 : i32
    %c0_i32_1 = arith.constant 0 : i32
    return %arg0, %c0_i32, %c0_i32_0 : i32, i32, i32
  }
  func.func @transform_5(%arg0: i32) -> (i32, i32, i32) {
    %c0_i32 = arith.constant 0 : i32
    %c0_i32_0 = arith.constant 0 : i32
    %c0_i32_1 = arith.constant 0 : i32
    return %arg0, %c0_i32, %c0_i32_0 : i32, i32, i32
  }
}

</mosaic_0001>

<bundles_post_ra>
// kernel: mul.1
= control target key start
LH: loop header
LB: loop body
LE: loop exit
PB: predicated region body
PF: predicated region fallthrough
CT: control target
= control target key end

     0   :  { %3 = vsyncpa [#allocation1], 0  ;;  %s69_s0 = inlined_call_operand.vmem [shape: s32[32,8], index: 0, kind: input, shape index: {}]   ;;  %s70_s1 = inlined_call_operand.vmem [shape: s32[32,8], index: 1, kind: input, shape index: {}]   ;;  %s71_s2 = inlined_call_operand.hbm [shape: s32[32,8], index: 2, kind: output, shape index: {}]  }
   0x1   :  { %v4_v0 = vld [vmem:[%s69_s0] sm:$0xff] }
   0x2   :  { %v5_v1 = vld [vmem:[%s70_s1] sm:$0xff]  ;;  %s44_s1 = smov [#allocation0]  }
   0x3   :  { %v8_v2 = vmul.u32 %v5_v1, %v4_v0  ;;  %s15_s12 = sshll.u32 %s44_s1, 4  ;;  %s16_s12 = int_to_ptr.vmem [resolvable:$true] %s15_s12 }
   0x4   :  { %s22_s13 = scalar_lea.vmem %s16_s12, 128  ;;  %p27_p1 = scmp.lt.s32.totalorder %s16_s12, %s16_s12 }
   0x5   :  { %10 = vst [vmem:[#allocation0] sm:$0xff] %v8_v2  ;;  %p23_p0 = scmp.ne.s32.totalorder %s16_s12, %s22_s13  ;;  %p28_p2 = scmp.lt.s32.totalorder %s22_s13, %s22_s13 }
   0x7   :  { %p29_p3 = por %p28_p2, %p27_p1 }
   0x9   :  { %p30_p4 = pnand %p29_p3, %p23_p0 }
   0xb   :  { %33 = shalt.err (!%p30_p4)
}
   0xc   :  { %18 = dma.vmem_to_hbm [thread:$0]  %s16_s12, 128, %s71_s2, [#allocation1]  }
   0xd   :  { %42 = dma.done.wait [#allocation1], 128  }
   0xe   :  { %43 = vsyncadd [#allocation1], 4294967168 }
   0xf   :  { %20 = vsyncpa [#allocation1], 1 }

// kernel: crf_model_forward.1
= control target key start
LH: loop header
LB: loop body
LE: loop exit
PB: predicated region body
PF: predicated region fallthrough
CT: control target
= control target key end

     0   :  { %s1290_s18 = smov 0   ;;  %s1684_s0 = inlined_call_operand.vmem [shape: bf16[2,128,128], index: 0, kind: input, shape index: {}]   ;;  %s1685_s1 = inlined_call_operand.vmem [shape: bf16[8,128], index: 1, kind: input, shape index: {}]   ;;  %s1686_s2 = inlined_call_operand.vmem [shape: f32[8,128], index: 2, kind: input, shape index: {}]   ;;  %s1687_s3 = inlined_call_operand.vmem [shape: f32[2,8,16], index: 3, kind: input, shape index: {}]   ;;  %s1688_s4 = inlined_call_operand.vmem [shape: f32[2,8,128], index: 4, kind: output, shape index: {0}]   ;;  %s1689_s5 = inlined_call_operand.vmem [shape: s32[2,1,128], index: 5, kind: output, shape index: {1}]  }
   0x1 LB: > { %s1135_s19 = sadd.s32 4294967295, %s1238_s18   ;;  %p1139_p0 = scmp.ge.s32.totalorder %s1238_s18, 1  ;;  %s1238_s18 = sphi %s1290_s18, %s16_s18  }
   0x2   : > { %p199_p1 = scmp.lt.s32.totalorder %s1238_s18, 3 }
   0x4   : > { %p200_p2 = pnand %p1139_p0, %p199_p1 }
   0x5   : > { %p233_p3 = scmp.lt.s32.totalorder (!%p200_p2), %s1135_s19, 1  ;;  %s1253_s7 = smov (!%p200_p2), 96  }
   0x6   : > { %203 = sbr.rel (%p200_p2) target bundleno = 756 (0x2f4), region = 36  ;;  %s1254_s8 = smov (!%p200_p2), 112  }
   0x7   : > { %s1255_s9 = smov (!%p200_p2), 64   ;;  %s1256_s10 = smov (!%p200_p2), 80  }
   0x8   : > { %s1257_s11 = smov (!%p200_p2), 32   ;;  %s1258_s12 = smov (!%p200_p2), 48  }
   0x9   : > { %s1259_s13 = smov (!%p200_p2), 16  }
   0xb   : > { %v1240_v0 = vmov 0.0   ;;  %vm1241_vm0 = vmmov 0   ;;  %v1301_v1 = vld [vmem:[%s1686_s2] sm:$0xff]  ;;  %s1707_s19 = smov (!%p233_p3, %s1135_s19), 1  ;;  %v1242_v2 = vmov 0   ;;  %v1243_v3 = vmov 8  }
   0xc   : > { %1164 = vmatprep.subr.bf16.mxu0 %v1240_v0  ;;  %1180 = vmatprep.mubr.msk.bf16.mxu0 %vm1241_vm0, %v1240_v0  ;;  %s1154_s22 = sshll.u32 %s1707_s19, 6  ;;  %v1244_v5 = vmov 1   ;;  %v1245_v6 = vmov 9   ;;  %v1246_v8 = vmov 2   ;;  %v1247_v9 = vmov 3   ;;  %s1142_s28 = sshll.u32 %s1707_s19, 3 }
   0xd   : > { %1214 = vset.pattern.permute.xlu1 %v1242_v2  ;;  %1212 = vset.pattern.permute.xlu0 %v1243_v3  ;;  %s1312_s25 = scalar_lea.vmem %s1684_s0, %s1154_s22  ;;  %v1248_v10 = vmov 4   ;;  %v1249_v11 = vmov 6   ;;  %v1250_v13 = vmov 5   ;;  %v1251_v14 = vmov 7   ;;  %v251_v20 = vld [vmem:[%s1685_s1] sm:$0xf]  ;;  %s245_s6 = scalar_lea.vmem %s1688_s4, %s1142_s28 }
   0xe   : > { %374 = vperm.xlu1 %1214, %v1301_v1   ;;  %270 = vperm.xlu0 %1212, %v1301_v1   ;;  %v1224_v4 = vld [vmem:[%s1312_s25 + $0x38] sm:$0xff]   ;;  %v1225_v7 = vld [vmem:[%s1312_s25 + $0x30] sm:$0xff]   ;;  %v1226_v12 = vld [vmem:[%s1312_s25 + $0x28] sm:$0xff]   ;;  %v362_v23 = vlaneseq  ;;  %v1252_v25 = vmov 10   ;;  %s1423_s16 = scalar_lea.vmem %s1687_s3, %s1142_s28  ;;  %s248_s21 = scalar_lea.vmem %s1689_s5, %s1707_s19 }
   0xf   : > { %1165 = vmatpush3.bf16.xpose.msra.mxu0 %v1224_v4  ;;  %v1227_v15 = vld [vmem:[%s1312_s25 + $0x20] sm:$0xff]   ;;  %v1228_v16 = vld [vmem:[%s1312_s25 + $0x18] sm:$0xff]   ;;  %v1229_v17 = vld [vmem:[%s1312_s25 + $0x10] sm:$0xff]  }
  0x10   : > { %1166 = vmatprep.subr.bf16.mxu0 %v1240_v0  ;;  %v1230_v18 = vld [vmem:[%s1312_s25 + $0x8] sm:$0xff]   ;;  %v1231_v19 = vld [vmem:[%s1312_s25] sm:$0xff]   ;;  %v1338_v26 = vshrl.u32 %v362_v23, 7 }
  0x12   : > { %1215 = vset.pattern.permute.xlu1 %v1244_v5  ;;  %1213 = vset.pattern.permute.xlu0 %v1245_v6  ;;  %v1348_v30 = vsub.s32 0, %v1338_v26  ;;  %v1351_v31 = vsub.s32 1, %v1338_v26  ;;  %v1354_v32 = vsub.s32 2, %v1338_v26  ;;  %v1361_v36 = vsub.s32 3, %v1338_v26 }
  0x13   : > { %383 = vperm.xlu1 %1215, %v1301_v1   ;;  %365 = vperm.xlu0 %1213, %v1301_v1   ;;  %v1366_v39 = vsub.s32 4, %v1338_v26  ;;  %v1375_v44 = vsub.s32 5, %v1338_v26  ;;  %v1386_v49 = vsub.s32 6, %v1338_v26  ;;  %v1394_v54 = vsub.s32 7, %v1338_v26 }
  0x17   : > { %1216 = vset.pattern.permute.xlu1 %v1246_v8  ;;  %1217 = vset.pattern.permute.xlu0 %v1247_v9 }
  0x18   : > { %395 = vperm.xlu1 %1216, %v1301_v1   ;;  %407 = vperm.xlu0 %1217, %v1301_v1  }
  0x19   : > { %1167 = vmatpush3.bf16.xpose.msra.mxu0 %v1225_v7 }
  0x1a   : > { %1168 = vmatprep.subr.bf16.mxu0 %v1240_v0 }
  0x1c   : > { %1218 = vset.pattern.permute.xlu1 %v1248_v10  ;;  %1220 = vset.pattern.permute.xlu0 %v1249_v11 }
  0x1d   : > { %419 = vperm.xlu1 %1218, %v1301_v1   ;;  %443 = vperm.xlu0 %1220, %v1301_v1  }
  0x21   : > { %1219 = vset.pattern.permute.xlu1 %v1250_v13  ;;  %1169 = vmatpush3.bf16.xpose.msra.mxu0 %v1226_v12 }
  0x22   : > { %431 = vperm.xlu1 %1219, %v1301_v1   ;;  %1170 = vmatprep.subr.bf16.mxu0 %v1240_v0 }
  0x23   : > { %1223 = vset.pattern.permute.xlu0 %v1252_v25 }
  0x26   : > { %1221 = vset.pattern.permute.xlu1 %v1251_v14 }
  0x27   : > { %455 = vperm.xlu1 %1221, %v1301_v1  }
  0x29   : > { %1171 = vmatpush3.bf16.xpose.msra.mxu0 %v1227_v15 }
  0x2a   : > { %1172 = vmatprep.subr.bf16.mxu0 %v1240_v0 }
  0x2b   : > { %1222 = vset.pattern.permute.xlu1 %v1252_v25 }
  0x31   : > { %1173 = vmatpush3.bf16.xpose.msra.mxu0 %v1228_v16 }
  0x32   : > { %1174 = vmatprep.subr.bf16.mxu0 %v1240_v0 }
  0x39   : > { %1175 = vmatpush3.bf16.xpose.msra.mxu0 %v1229_v17 }
  0x3a   : > { %1176 = vmatprep.subr.bf16.mxu0 %v1240_v0 }
  0x41   : > { %1177 = vmatpush3.bf16.xpose.msra.mxu0 %v1230_v18 }
  0x42   : > { %1178 = vmatprep.subr.bf16.mxu0 %v1240_v0 }
  0x49   : > { %1179 = vmatpush3.bf16.xpose.msra.mxu0 %v1231_v19 }
  0x50   : > { %1181 = vmatmul.mubr.bf16.vlgmr.msra.gmra.mxu0 %v251_v20  ;;  %v1691_v20 = vmov 0 }
  0x89   : > { %v1333_v21 = vpop.permute.xlu1 %374  ;;  %v271_v24 = vpop.permute.xlu0 %270 }
  0x8e   : > { %v1335_v22 = vpop.permute.xlu1 %383  ;;  %v366_v33 = vpop.permute.xlu0 %365 }
  0x93   : > { %v1340_v27 = vpop.permute.xlu1 %395  ;;  %v1383_v48 = vpop.permute.xlu0 %407 }
  0x98   : > { %v1363_v37 = vpop.permute.xlu1 %419  ;;  %v1405_v63 = vpop.permute.xlu0 %443 }
  0x9d   : > { %v1391_v53 = vpop.permute.xlu1 %431 }
  0xa2   : > { %v1412_v6 = vpop.permute.xlu1 %455 }
 0x110   : > { %v355_v28 = vpop.f32.mrf.mxu0 }
 0x111   : > { %v356_v29 = vadd.f32 %v355_v28, %v271_v24 }
 0x112   : > { %v1182_v34 = vpop.f32.mrf.mxu0 }
 0x113   : > { %v1356_v35 = vadd.f32 %v366_v33, %v356_v29  ;;  %540 = vrot.lane.b32.xlu0 %v356_v29, %s1253_s7  ;;  %465 = vrot.lane.b32.xlu1 %v356_v29, %s1254_s8  ;;  %361 = vst [vmem:[%s245_s6] sm:$0xff] %v356_v29 }
 0x114   : > { %v358_v38 = vpop.f32.mrf.mxu0 }
 0x115   : > { %v372_v40 = vrot.slane %v1356_v35, %v1348_v30  ;;  %v381_v41 = vrot.slane %v1356_v35, %v1351_v31  ;;  %v393_v42 = vrot.slane %v1356_v35, %v1354_v32  ;;  %v405_v47 = vrot.slane %v1356_v35, %v1361_v36 }
 0x116   : > { %v1183_v43 = vpop.f32.mrf.mxu0  ;;  %v417_v52 = vrot.slane %v1356_v35, %v1366_v39  ;;  %v429_v56 = vrot.slane %v1356_v35, %v1375_v44  ;;  %v441_v62 = vrot.slane %v1356_v35, %v1386_v49  ;;  %v453_v3 = vrot.slane %v1356_v35, %v1394_v54 }
 0x117   : > { %690 = vrot.lane.b32.xlu0 %v356_v29, %s1255_s9  ;;  %615 = vrot.lane.b32.xlu1 %v356_v29, %s1256_s10  ;;  %v377_v45 = vadd.f32 %v1333_v21, %v372_v40  ;;  %v386_v46 = vadd.f32 %v1335_v22, %v381_v41  ;;  %v398_v51 = vadd.f32 %v1340_v27, %v393_v42 }
 0x118   : > { %v410_v58 = vadd.f32 %v1383_v48, %v405_v47  ;;  %v422_v61 = vadd.f32 %v1363_v37, %v417_v52  ;;  %v434_v5 = vadd.f32 %v1391_v53, %v429_v56  ;;  %v446_v9 = vadd.f32 %v1405_v63, %v441_v62 }
 0x119   : > { %vm387_vm1 = vcmp.gt.f32.partialorder %v386_v46, %v377_v45  ;;  %v389_v50 = vmax.f32 %v377_v45, %v386_v46  ;;  %v458_v12 = vadd.f32 %v1412_v6, %v453_v3 }
 0x11a   : > { %v388_v55 = vsel %vm387_vm1, 1, %v1242_v2 }
 0x11b   : > { %840 = vrot.lane.b32.xlu0 %v356_v29, %s1257_s11  ;;  %765 = vrot.lane.b32.xlu1 %v356_v29, %s1258_s12  ;;  %vm399_vm2 = vcmp.gt.f32.partialorder %v398_v51, %v389_v50  ;;  %v401_v57 = vmax.f32 %v389_v50, %v398_v51 }
 0x11c   : > { %v400_v59 = vsel %vm399_vm2, 2, %v388_v55 }
 0x11d   : > { %vm411_vm3 = vcmp.gt.f32.partialorder %v410_v58, %v401_v57  ;;  %v413_v60 = vmax.f32 %v401_v57, %v410_v58 }
 0x11e   : > { %v412_v0 = vsel %vm411_vm3, 3, %v400_v59 }
 0x11f   : > { %915 = vrot.lane.b32.xlu0 %v356_v29, %s1259_s13  ;;  %vm423_vm4 = vcmp.gt.f32.partialorder %v422_v61, %v413_v60  ;;  %v425_v4 = vmax.f32 %v413_v60, %v422_v61  ;;  %928 = vperm.xlu1 %1222, %v1301_v1   ;;  %v462_v1 = vld [vmem:[%s1423_s16 + $0x1] sm:$0x1]  ;;  %v538_v29 = vld [vmem:[%s1423_s16 + $0x2] sm:$0x1] }
 0x120   : > { %v424_v7 = vsel %vm423_vm4, 4, %v412_v0  ;;  %vm463_vm8 = vcmp.gt.f32.partialorder %v462_v1, 0.0  ;;  %vm539_vm10 = vcmp.gt.f32.partialorder %v538_v29, 0.0 }
 0x121   : > { %vm435_vm5 = vcmp.gt.f32.partialorder %v434_v5, %v425_v4  ;;  %v437_v8 = vmax.f32 %v425_v4, %v434_v5  ;;  %v469_v15 = vsel %vm463_vm8, 1, %v1242_v2  ;;  %v544_v47 = vsel %vm539_vm10, 1, %v1242_v2 }
 0x122   : > { %v436_v10 = vsel %vm435_vm5, 5, %v424_v7  ;;  %v473_v16 = vrot.slane %v469_v15, %v1348_v30  ;;  %v548_v60 = vrot.slane %v544_v47, %v1348_v30  ;;  %v613_v15 = vld [vmem:[%s1423_s16 + $0x3] sm:$0x1] }
 0x123   : > { %vm447_vm6 = vcmp.gt.f32.partialorder %v446_v9, %v437_v8  ;;  %v449_v11 = vmax.f32 %v437_v8, %v446_v9  ;;  %vm614_vm3 = vcmp.gt.f32.partialorder %v613_v15, 0.0 }
 0x124   : > { %v448_v13 = vsel %vm447_vm6, 6, %v436_v10  ;;  %vm1428_vm9 = vcmp.eq.s32.totalorder %v473_v16, 1  ;;  %vm1455_vm1 = vcmp.eq.s32.totalorder %v548_v60, 1 }
 0x125   : > { %vm459_vm7 = vcmp.gt.f32.partialorder %v458_v12, %v449_v11  ;;  %v461_v17 = vmax.f32 %v449_v11, %v458_v12  ;;  %v1692_v20 = vsel %vm1428_vm9, 4294967295, %v1691_v20 }
 0x126   : > { %v1416_v14 = vsel %vm459_vm7, 7, %v448_v13 }
 0x185   : > { %v466_v18 = vpop.permute.xlu1 %465  ;;  %v541_v10 = vpop.permute.xlu0 %540 }
 0x186   : > { %v468_v19 = vadd.f32 %v466_v18, %v461_v17 }
 0x188   : > { %v475_v23 = vsel %vm1428_vm9, %v468_v19, %v1356_v35 }
 0x189   : > { %v480_v24 = vrot.slane %v475_v23, %v1348_v30  ;;  %v485_v25 = vrot.slane %v475_v23, %v1351_v31  ;;  %v493_v28 = vrot.slane %v475_v23, %v1354_v32  ;;  %v501_v38 = vrot.slane %v475_v23, %v1361_v36 }
 0x18a   : > { %v509_v42 = vrot.slane %v475_v23, %v1366_v39  ;;  %v517_v46 = vrot.slane %v475_v23, %v1375_v44  ;;  %v525_v55 = vrot.slane %v475_v23, %v1386_v49  ;;  %v533_v59 = vrot.slane %v475_v23, %v1394_v54 }
 0x18b   : > { %v481_v33 = vadd.f32 %v480_v24, %v1333_v21  ;;  %v486_v34 = vadd.f32 %v485_v25, %v1335_v22  ;;  %v494_v41 = vadd.f32 %v493_v28, %v1340_v27  ;;  %v502_v45 = vadd.f32 %v501_v38, %v1383_v48 }
 0x18c   : > { %v510_v52 = vadd.f32 %v509_v42, %v1363_v37  ;;  %v518_v58 = vadd.f32 %v517_v46, %v1391_v53  ;;  %v526_v0 = vadd.f32 %v525_v55, %v1405_v63  ;;  %v534_v5 = vadd.f32 %v533_v59, %v1412_v6 }
 0x18d   : > { %v489_v40 = vmax.f32 %v481_v33, %v486_v34  ;;  %vm487_vm11 = vcmp.gt.f32.partialorder %v486_v34, %v481_v33 }
 0x18e   : > { %v488_v35 = vsel %vm487_vm11, 1, %v1242_v2 }
 0x18f   : > { %v497_v43 = vmax.f32 %v489_v40, %v494_v41  ;;  %vm495_vm12 = vcmp.gt.f32.partialorder %v494_v41, %v489_v40  ;;  %v619_v41 = vsel %vm614_vm3, 1, %v1242_v2 }
 0x190   : > { %v496_v50 = vsel %vm495_vm12, 2, %v488_v35 }
 0x191   : > { %v505_v51 = vmax.f32 %v497_v43, %v502_v45  ;;  %vm503_vm13 = vcmp.gt.f32.partialorder %v502_v45, %v497_v43 }
 0x192   : > { %v504_v56 = vsel %vm503_vm13, 3, %v496_v50 }
 0x193   : > { %v513_v57 = vmax.f32 %v505_v51, %v510_v52  ;;  %vm511_vm14 = vcmp.gt.f32.partialorder %v510_v52, %v505_v51  ;;  %v623_v52 = vrot.slane %v619_v41, %v1348_v30 }
 0x194   : > { %v512_v61 = vsel %vm511_vm14, 4, %v504_v56 }
 0x195   : > { %v521_v62 = vmax.f32 %v513_v57, %v518_v58  ;;  %vm519_vm15 = vcmp.gt.f32.partialorder %v518_v58, %v513_v57  ;;  %vm1487_vm11 = vcmp.eq.s32.totalorder %v623_v52, 1 }
 0x196   : > { %v520_v3 = vsel %vm519_vm15, 5, %v512_v61 }
 0x197   : > { %v529_v4 = vmax.f32 %v521_v62, %v526_v0  ;;  %vm527_vm0 = vcmp.gt.f32.partialorder %v526_v0, %v521_v62 }
 0x198   : > { %v528_v8 = vsel %vm527_vm0, 6, %v520_v3  ;;  %v616_v3 = vpop.permute.xlu1 %615 }
 0x199   : > { %v537_v9 = vmax.f32 %v529_v4, %v534_v5  ;;  %vm535_vm2 = vcmp.gt.f32.partialorder %v534_v5, %v529_v4 }
 0x19a   : > { %v1459_v11 = vsel %vm535_vm2, 7, %v528_v8 }
 0x19b   : > { %v543_v12 = vadd.f32 %v541_v10, %v537_v9  ;;  %v551_v13 = vsel %vm1455_vm1, %v1459_v11, %v1338_v26 }
 0x19d   : > { %v550_v1 = vsel %vm1455_vm1, %v543_v12, %v475_v23  ;;  %vm954_vm1 = vcmask 1041280  }
 0x19e   : > { %v555_v16 = vrot.slane %v550_v1, %v1348_v30  ;;  %v560_v17 = vrot.slane %v550_v1, %v1351_v31  ;;  %v568_v18 = vrot.slane %v550_v1, %v1354_v32  ;;  %v576_v25 = vrot.slane %v550_v1, %v1361_v36 }
 0x19f   : > { %v584_v23 = vrot.slane %v550_v1, %v1366_v39  ;;  %v592_v40 = vrot.slane %v550_v1, %v1375_v44  ;;  %v600_v45 = vrot.slane %v550_v1, %v1386_v49  ;;  %v608_v51 = vrot.slane %v550_v1, %v1394_v54 }
 0x1a0   : > { %v556_v19 = vadd.f32 %v555_v16, %v1333_v21  ;;  %v561_v24 = vadd.f32 %v560_v17, %v1335_v22  ;;  %v569_v29 = vadd.f32 %v568_v18, %v1340_v27  ;;  %v577_v38 = vadd.f32 %v576_v25, %v1383_v48  ;;  %v688_v16 = vld [vmem:[%s1423_s16 + $0x4] sm:$0x1] }
 0x1a1   : > { %v585_v43 = vadd.f32 %v584_v23, %v1363_v37  ;;  %v593_v50 = vadd.f32 %v592_v40, %v1391_v53  ;;  %v601_v57 = vadd.f32 %v600_v45, %v1405_v63  ;;  %v609_v60 = vadd.f32 %v608_v51, %v1412_v6 }
 0x1a2   : > { %vm562_vm4 = vcmp.gt.f32.partialorder %v561_v24, %v556_v19  ;;  %v564_v28 = vmax.f32 %v556_v19, %v561_v24  ;;  %vm689_vm13 = vcmp.gt.f32.partialorder %v688_v16, 0.0 }
 0x1a3   : > { %v563_v33 = vsel %vm562_vm4, 1, %v1242_v2 }
 0x1a4   : > { %vm570_vm5 = vcmp.gt.f32.partialorder %v569_v29, %v564_v28  ;;  %v572_v34 = vmax.f32 %v564_v28, %v569_v29 }
 0x1a5   : > { %v571_v42 = vsel %vm570_vm5, 2, %v563_v33 }
 0x1a6   : > { %vm578_vm6 = vcmp.gt.f32.partialorder %v577_v38, %v572_v34  ;;  %v580_v35 = vmax.f32 %v572_v34, %v577_v38  ;;  %v694_v34 = vsel %vm689_vm13, 1, %v1242_v2 }
 0x1a7   : > { %v579_v46 = vsel %vm578_vm6, 3, %v571_v42 }
 0x1a8   : > { %vm586_vm7 = vcmp.gt.f32.partialorder %v585_v43, %v580_v35  ;;  %v588_v47 = vmax.f32 %v580_v35, %v585_v43 }
 0x1a9   : > { %v587_v55 = vsel %vm586_vm7, 4, %v579_v46 }
 0x1aa   : > { %vm594_vm8 = vcmp.gt.f32.partialorder %v593_v50, %v588_v47  ;;  %v596_v56 = vmax.f32 %v588_v47, %v593_v50  ;;  %v698_v47 = vrot.slane %v694_v34, %v1348_v30 }
 0x1ab   : > { %v595_v58 = vsel %vm594_vm8, 5, %v587_v55 }
 0x1ac   : > { %vm602_vm10 = vcmp.gt.f32.partialorder %v601_v57, %v596_v56  ;;  %v604_v59 = vmax.f32 %v596_v56, %v601_v57  ;;  %vm1519_vm5 = vcmp.eq.s32.totalorder %v698_v47, 1 }
 0x1ad   : > { %v603_v62 = vsel %vm602_vm10, 6, %v595_v58 }
 0x1ae   : > { %vm610_vm12 = vcmp.gt.f32.partialorder %v609_v60, %v604_v59  ;;  %v612_v0 = vmax.f32 %v604_v59, %v609_v60 }
 0x1af   : > { %v1491_v4 = vsel %vm610_vm12, 7, %v603_v62  ;;  %v691_v62 = vpop.permute.xlu0 %690 }
 0x1b0   : > { %v618_v5 = vadd.f32 %v616_v3, %v612_v0  ;;  %v626_v8 = vsel %vm1487_vm11, %v1491_v4, %v1338_v26 }
 0x1b2   : > { %v625_v9 = vsel %vm1487_vm11, %v618_v5, %v550_v1  ;;  %vm1705_vm11 = vnez %v1692_v20 }
 0x1b3   : > { %v630_v10 = vrot.slane %v625_v9, %v1348_v30  ;;  %v635_v12 = vrot.slane %v625_v9, %v1351_v31  ;;  %v643_v15 = vrot.slane %v625_v9, %v1354_v32  ;;  %v651_v19 = vrot.slane %v625_v9, %v1361_v36 }
 0x1b4   : > { %v659_v28 = vrot.slane %v625_v9, %v1366_v39  ;;  %v667_v33 = vrot.slane %v625_v9, %v1375_v44  ;;  %v675_v42 = vrot.slane %v625_v9, %v1386_v49  ;;  %v683_v46 = vrot.slane %v625_v9, %v1394_v54 }
 0x1b5   : > { %v631_v17 = vadd.f32 %v630_v10, %v1333_v21  ;;  %v636_v18 = vadd.f32 %v635_v12, %v1335_v22  ;;  %v644_v25 = vadd.f32 %v643_v15, %v1340_v27  ;;  %v652_v23 = vadd.f32 %v651_v19, %v1383_v48  ;;  %v763_v12 = vld [vmem:[%s1423_s16 + $0x5] sm:$0x1] }
 0x1b6   : > { %v660_v41 = vadd.f32 %v659_v28, %v1363_v37  ;;  %v668_v45 = vadd.f32 %v667_v33, %v1391_v53  ;;  %v676_v52 = vadd.f32 %v675_v42, %v1405_v63  ;;  %v684_v57 = vadd.f32 %v683_v46, %v1412_v6 }
 0x1b7   : > { %v639_v24 = vmax.f32 %v631_v17, %v636_v18  ;;  %vm637_vm14 = vcmp.gt.f32.partialorder %v636_v18, %v631_v17  ;;  %vm764_vm7 = vcmp.gt.f32.partialorder %v763_v12, 0.0 }
 0x1b8   : > { %v638_v1 = vsel %vm637_vm14, 1, %v1242_v2  ;;  %v769_v34 = vsel %vm764_vm7, 1, %v1242_v2 }
 0x1b9   : > { %v647_v29 = vmax.f32 %v639_v24, %v644_v25  ;;  %vm645_vm15 = vcmp.gt.f32.partialorder %v644_v25, %v639_v24  ;;  %v773_v47 = vrot.slane %v769_v34, %v1348_v30 }
 0x1ba   : > { %v646_v38 = vsel %vm645_vm15, 2, %v638_v1 }
 0x1bb   : > { %v655_v40 = vmax.f32 %v647_v29, %v652_v23  ;;  %vm653_vm0 = vcmp.gt.f32.partialorder %v652_v23, %v647_v29 }
 0x1bc   : > { %v654_v35 = vsel %vm653_vm0, 3, %v646_v38  ;;  %vm1551_vm0 = vcmp.eq.s32.totalorder %v773_v47, 1 }
 0x1bd   : > { %v663_v43 = vmax.f32 %v655_v40, %v660_v41  ;;  %vm661_vm2 = vcmp.gt.f32.partialorder %v660_v41, %v655_v40 }
 0x1be   : > { %v662_v50 = vsel %vm661_vm2, 4, %v654_v35 }
 0x1bf   : > { %v671_v51 = vmax.f32 %v663_v43, %v668_v45  ;;  %vm669_vm3 = vcmp.gt.f32.partialorder %v668_v45, %v663_v43 }
 0x1c0   : > { %v670_v55 = vsel %vm669_vm3, 5, %v662_v50 }
 0x1c1   : > { %v679_v56 = vmax.f32 %v671_v51, %v676_v52  ;;  %vm677_vm4 = vcmp.gt.f32.partialorder %v676_v52, %v671_v51 }
 0x1c2   : > { %v678_v59 = vsel %vm677_vm4, 6, %v670_v55 }
 0x1c3   : > { %v687_v60 = vmax.f32 %v679_v56, %v684_v57  ;;  %vm685_vm6 = vcmp.gt.f32.partialorder %v684_v57, %v679_v56 }
 0x1c4   : > { %v1523_v0 = vsel %vm685_vm6, 7, %v678_v59 }
 0x1c5   : > { %v693_v3 = vadd.f32 %v691_v62, %v687_v60  ;;  %v701_v5 = vsel %vm1519_vm5, %v1523_v0, %v1338_v26 }
 0x1c7   : > { %v700_v10 = vsel %vm1519_vm5, %v693_v3, %v625_v9  ;;  %v766_v3 = vpop.permute.xlu1 %765 }
 0x1c8   : > { %v705_v15 = vrot.slane %v700_v10, %v1348_v30  ;;  %v710_v16 = vrot.slane %v700_v10, %v1351_v31  ;;  %v718_v17 = vrot.slane %v700_v10, %v1354_v32  ;;  %v726_v24 = vrot.slane %v700_v10, %v1361_v36 }
 0x1c9   : > { %v734_v9 = vrot.slane %v700_v10, %v1366_v39  ;;  %v742_v33 = vrot.slane %v700_v10, %v1375_v44  ;;  %v750_v42 = vrot.slane %v700_v10, %v1386_v49  ;;  %v758_v46 = vrot.slane %v700_v10, %v1394_v54 }
 0x1ca   : > { %v706_v18 = vadd.f32 %v705_v15, %v1333_v21  ;;  %v711_v19 = vadd.f32 %v710_v16, %v1335_v22  ;;  %v719_v28 = vadd.f32 %v718_v17, %v1340_v27  ;;  %v727_v23 = vadd.f32 %v726_v24, %v1383_v48 }
 0x1cb   : > { %v735_v41 = vadd.f32 %v734_v9, %v1363_v37  ;;  %v743_v45 = vadd.f32 %v742_v33, %v1391_v53  ;;  %v751_v52 = vadd.f32 %v750_v42, %v1405_v63  ;;  %v759_v57 = vadd.f32 %v758_v46, %v1412_v6 }
 0x1cc   : > { %vm712_vm8 = vcmp.gt.f32.partialorder %v711_v19, %v706_v18  ;;  %v714_v25 = vmax.f32 %v706_v18, %v711_v19  ;;  %v838_v18 = vld [vmem:[%s1423_s16 + $0x6] sm:$0x1] }
 0x1cd   : > { %v713_v1 = vsel %vm712_vm8, 1, %v1242_v2  ;;  %vm839_vm3 = vcmp.gt.f32.partialorder %v838_v18, 0.0 }
 0x1ce   : > { %vm720_vm10 = vcmp.gt.f32.partialorder %v719_v28, %v714_v25  ;;  %v722_v29 = vmax.f32 %v714_v25, %v719_v28 }
 0x1cf   : > { %v721_v38 = vsel %vm720_vm10, 2, %v713_v1 }
 0x1d0   : > { %vm728_vm12 = vcmp.gt.f32.partialorder %v727_v23, %v722_v29  ;;  %v730_v40 = vmax.f32 %v722_v29, %v727_v23 }
 0x1d1   : > { %v729_v35 = vsel %vm728_vm12, 3, %v721_v38 }
 0x1d2   : > { %vm736_vm13 = vcmp.gt.f32.partialorder %v735_v41, %v730_v40  ;;  %v738_v43 = vmax.f32 %v730_v40, %v735_v41  ;;  %v844_v41 = vsel %vm839_vm3, 1, %v1242_v2  ;;  %vm932_vm3 = vcmask 130048  }
 0x1d3   : > { %v737_v50 = vsel %vm736_vm13, 4, %v729_v35 }
 0x1d4   : > { %vm744_vm14 = vcmp.gt.f32.partialorder %v743_v45, %v738_v43  ;;  %v746_v51 = vmax.f32 %v738_v43, %v743_v45 }
 0x1d5   : > { %v745_v55 = vsel %vm744_vm14, 5, %v737_v50 }
 0x1d6   : > { %vm752_vm15 = vcmp.gt.f32.partialorder %v751_v52, %v746_v51  ;;  %v754_v56 = vmax.f32 %v746_v51, %v751_v52  ;;  %v848_v52 = vrot.slane %v844_v41, %v1348_v30 }
 0x1d7   : > { %v753_v60 = vsel %vm752_vm15, 6, %v745_v55 }
 0x1d8   : > { %vm760_vm2 = vcmp.gt.f32.partialorder %v759_v57, %v754_v56  ;;  %v762_v62 = vmax.f32 %v754_v56, %v759_v57  ;;  %vm1583_vm13 = vcmp.eq.s32.totalorder %v848_v52, 1 }
 0x1d9   : > { %v1555_v12 = vsel %vm760_vm2, 7, %v753_v60 }
 0x1da   : > { %v768_v15 = vadd.f32 %v766_v3, %v762_v62  ;;  %v776_v16 = vsel %vm1551_vm0, %v1555_v12, %v1338_v26 }
 0x1dc   : > { %v775_v17 = vsel %vm1551_vm0, %v768_v15, %v700_v10 }
 0x1dd   : > { %v780_v19 = vrot.slane %v775_v17, %v1348_v30  ;;  %v785_v24 = vrot.slane %v775_v17, %v1351_v31  ;;  %v793_v25 = vrot.slane %v775_v17, %v1354_v32  ;;  %v801_v1 = vrot.slane %v775_v17, %v1361_v36 }
 0x1de   : > { %v809_v33 = vrot.slane %v775_v17, %v1366_v39  ;;  %v817_v40 = vrot.slane %v775_v17, %v1375_v44  ;;  %v825_v45 = vrot.slane %v775_v17, %v1386_v49  ;;  %v833_v51 = vrot.slane %v775_v17, %v1394_v54 }
 0x1df   : > { %v781_v28 = vadd.f32 %v780_v19, %v1333_v21  ;;  %v786_v9 = vadd.f32 %v785_v24, %v1335_v22  ;;  %v794_v23 = vadd.f32 %v793_v25, %v1340_v27  ;;  %v802_v38 = vadd.f32 %v801_v1, %v1383_v48  ;;  %v841_v24 = vpop.permute.xlu0 %840 }
 0x1e0   : > { %v810_v43 = vadd.f32 %v809_v33, %v1363_v37  ;;  %v818_v50 = vadd.f32 %v817_v40, %v1391_v53  ;;  %v826_v57 = vadd.f32 %v825_v45, %v1405_v63  ;;  %v834_v3 = vadd.f32 %v833_v51, %v1412_v6  ;;  %v913_v45 = vld [vmem:[%s1423_s16 + $0x7] sm:$0x1] }
 0x1e1   : > { %v789_v29 = vmax.f32 %v781_v28, %v786_v9  ;;  %vm787_vm4 = vcmp.gt.f32.partialorder %v786_v9, %v781_v28  ;;  %vm914_vm15 = vcmp.gt.f32.partialorder %v913_v45, 0.0 }
 0x1e2   : > { %v788_v10 = vsel %vm787_vm4, 1, %v1242_v2 }
 0x1e3   : > { %v797_v34 = vmax.f32 %v789_v29, %v794_v23  ;;  %vm795_vm6 = vcmp.gt.f32.partialorder %v794_v23, %v789_v29 }
 0x1e4   : > { %v796_v42 = vsel %vm795_vm6, 2, %v788_v10 }
 0x1e5   : > { %v805_v35 = vmax.f32 %v797_v34, %v802_v38  ;;  %vm803_vm7 = vcmp.gt.f32.partialorder %v802_v38, %v797_v34 }
 0x1e6   : > { %v804_v46 = vsel %vm803_vm7, 3, %v796_v42 }
 0x1e7   : > { %v813_v47 = vmax.f32 %v805_v35, %v810_v43  ;;  %vm811_vm8 = vcmp.gt.f32.partialorder %v810_v43, %v805_v35 }
 0x1e8   : > { %v812_v55 = vsel %vm811_vm8, 4, %v804_v46 }
 0x1e9   : > { %v821_v56 = vmax.f32 %v813_v47, %v818_v50  ;;  %vm819_vm10 = vcmp.gt.f32.partialorder %v818_v50, %v813_v47  ;;  %v919_v47 = vsel %vm914_vm15, 1, %v1242_v2 }
 0x1ea   : > { %v820_v60 = vsel %vm819_vm10, 5, %v812_v55  ;;  %v923_v50 = vrot.slane %v919_v47, %v1348_v30 }
 0x1eb   : > { %v829_v62 = vmax.f32 %v821_v56, %v826_v57  ;;  %vm827_vm12 = vcmp.gt.f32.partialorder %v826_v57, %v821_v56 }
 0x1ec   : > { %v828_v18 = vsel %vm827_vm12, 6, %v820_v60  ;;  %vm1614_vm2 = vcmp.eq.s32.totalorder %v923_v50, 1 }
 0x1ed   : > { %v837_v19 = vmax.f32 %v829_v62, %v834_v3  ;;  %vm835_vm14 = vcmp.gt.f32.partialorder %v834_v3, %v829_v62 }
 0x1ee   : > { %v1587_v25 = vsel %vm835_vm14, 7, %v828_v18 }
 0x1ef   : > { %v843_v28 = vadd.f32 %v841_v24, %v837_v19  ;;  %v851_v9 = vsel %vm1583_vm13, %v1587_v25, %v1338_v26 }
 0x1f1   : > { %v850_v1 = vsel %vm1583_vm13, %v843_v28, %v775_v17 }
 0x1f2   : > { %v855_v29 = vrot.slane %v850_v1, %v1348_v30  ;;  %v860_v23 = vrot.slane %v850_v1, %v1351_v31  ;;  %v868_v33 = vrot.slane %v850_v1, %v1354_v32  ;;  %v876_v38 = vrot.slane %v850_v1, %v1361_v36 }
 0x1f3   : > { %v884_v42 = vrot.slane %v850_v1, %v1366_v39  ;;  %v892_v43 = vrot.slane %v850_v1, %v1375_v44  ;;  %v908_v46 = vrot.slane %v850_v1, %v1394_v54 }
 0x1f4   : > { %v856_v10 = vadd.f32 %v855_v29, %v1333_v21  ;;  %v861_v34 = vadd.f32 %v860_v23, %v1335_v22  ;;  %v869_v41 = vadd.f32 %v868_v33, %v1340_v27  ;;  %v877_v17 = vadd.f32 %v876_v38, %v1383_v48 }
 0x1f5   : > { %v885_v32 = vadd.f32 %v884_v42, %v1363_v37  ;;  %v900_v21 = vrot.slane %v850_v1, %v1386_v49  ;;  %v893_v36 = vadd.f32 %v892_v43, %v1391_v53  ;;  %v909_v44 = vadd.f32 %v908_v46, %v1412_v6  ;;  %v916_v37 = vpop.permute.xlu0 %915  ;;  %v929_v49 = vpop.permute.xlu1 %928 }
 0x1f6   : > { %v864_v40 = vmax.f32 %v856_v10, %v861_v34  ;;  %vm862_vm4 = vcmp.gt.f32.partialorder %v861_v34, %v856_v10 }
 0x1f7   : > { %v901_v39 = vadd.f32 %v900_v21, %v1405_v63  ;;  %v863_v60 = vsel %vm862_vm4, 1, %v1242_v2 }
 0x1f8   : > { %v872_v35 = vmax.f32 %v864_v40, %v869_v41  ;;  %vm870_vm6 = vcmp.gt.f32.partialorder %v869_v41, %v864_v40 }
 0x1f9   : > { %v871_v3 = vsel %vm870_vm6, 2, %v863_v60 }
 0x1fa   : > { %v880_v31 = vmax.f32 %v872_v35, %v877_v17  ;;  %vm878_vm7 = vcmp.gt.f32.partialorder %v877_v17, %v872_v35 }
 0x1fb   : > { %v879_v19 = vsel %vm878_vm7, 3, %v871_v3 }
 0x1fc   : > { %v888_v22 = vmax.f32 %v880_v31, %v885_v32  ;;  %vm886_vm10 = vcmp.gt.f32.partialorder %v885_v32, %v880_v31 }
 0x1fd   : > { %v887_v29 = vsel %vm886_vm10, 4, %v879_v19  ;;  %vm967_vm10 = vcmask 910080  }
 0x1fe   : > { %v896_v27 = vmax.f32 %v888_v22, %v893_v36  ;;  %vm894_vm12 = vcmp.gt.f32.partialorder %v893_v36, %v888_v22 }
 0x1ff   : > { %v895_v33 = vsel %vm894_vm12, 5, %v887_v29  ;;  %v476_v29 = vsel %vm1705_vm11, %v1416_v14, %v1338_v26  ;;  %vm980_vm12 = vcmask 778880  }
 0x200   : > { %v904_v48 = vmax.f32 %v896_v27, %v901_v39  ;;  %vm902_vm15 = vcmp.gt.f32.partialorder %v901_v39, %v896_v27 }
 0x201   : > { %v903_v10 = vsel %vm902_vm15, 6, %v895_v33  ;;  %vm1006_vm15 = vcmask 516480  }
 0x202   : > { %v912_v51 = vmax.f32 %v904_v48, %v909_v44  ;;  %vm910_vm4 = vcmp.gt.f32.partialorder %v909_v44, %v904_v48 }
 0x203   : > { %v911_v40 = vsel %vm910_vm4, 7, %v903_v10  ;;  %vm1019_vm4 = vcmask 385280  }
 0x204   : > { %v918_v52 = vadd.f32 %v916_v37, %v912_v51  ;;  %v926_v42 = vsel %vm1614_vm2, %v911_v40, %v1338_v26 }
 0x206   : > { %v925_v53 = vsel %vm1614_vm2, %v918_v52, %v850_v1 }
 0x207   : > { %v931_v54 = vadd.f32 %v929_v49, %v925_v53 }
 0x209   : > { %v933_v63 = vsel %vm932_vm3, %v931_v54, -inf }
 0x20a   : > { %v934_v56 = vrot.slane %v933_v63, 4 }
 0x20c   : > { %v935_v57 = vmax.f32 %v933_v63, %v934_v56 }
 0x20e   : > { %v936_v6 = vrot.slane %v935_v57, 2 }
 0x210   : > { %v937_v30 = vmax.f32 %v935_v57, %v936_v6 }
 0x212   : > { %v938_v62 = vrot.slane %v937_v30, 1 }
 0x214   : > { %v939_v18 = vmax.f32 %v937_v30, %v938_v62 }
 0x216   : > { %vm940_vm8 = vcmp.eq.f32.partialorder %v931_v54, %v939_v18 }
 0x217   : > { %v941_v24 = vsel %vm940_vm8, %v1338_v26, 8 }
 0x218   : > { %v942_v28 = vsel %vm932_vm3, %v941_v24, 2147483647 }
 0x219   : > { %v943_v1 = vrot.slane %v942_v28, 4 }
 0x21b   : > { %vm944_vm14 = vcmp.lt.s32.totalorder %v942_v28, %v943_v1 }
 0x21c   : > { %v945_v23 = vsel %vm944_vm14, %v942_v28, %v943_v1  ;;  %vm993_vm14 = vcmask 647680  }
 0x21d   : > { %v946_v2 = vrot.slane %v945_v23, 2 }
 0x21f   : > { %vm947_vm9 = vcmp.lt.s32.totalorder %v945_v23, %v946_v2 }
 0x220   : > { %v948_v34 = vsel %vm947_vm9, %v945_v23, %v946_v2 }
 0x221   : > { %v949_v38 = vrot.slane %v948_v34, 1 }
 0x223   : > { %vm950_vm6 = vcmp.lt.s32.totalorder %v948_v34, %v949_v38 }
 0x224   : > { %v951_v41 = vsel %vm950_vm6, %v948_v34, %v949_v38  ;;  %vm1032_vm6 = vcmask 254080  }
 0x225   : > { %952 = vrot.lane.b32.xlu1 %v951_v41, %s1254_s8  ;;  %vm956_vm7 = vcmp.eq.s32.totalorder %v1338_v26, %v951_v41 }
 0x226   : > { %v957_v35 = vsel %vm956_vm7, %v926_v42, 0  ;;  %vm1043_vm7 = vcmask 122880  }
 0x227   : > { %v958_v17 = vsel %vm932_vm3, %v957_v35, 0 }
 0x228   : > { %v959_v43 = vrot.slane %v958_v17, 4 }
 0x22a   : > { %v960_v45 = vadd.s32 %v959_v43, %v958_v17 }
 0x22c   : > { %v961_v31 = vrot.slane %v960_v45, 2 }
 0x22e   : > { %v962_v32 = vadd.s32 %v961_v31, %v960_v45 }
 0x230   : > { %v963_v21 = vrot.slane %v962_v32, 1 }
 0x232   : > { %v964_v22 = vadd.s32 %v963_v21, %v962_v32 }
 0x234   : > { %965 = vrot.lane.b32.xlu0 %v964_v22, %s1253_s7  ;;  %vm969_vm9 = vcmp.eq.s32.totalorder %v1338_v26, %v964_v22 }
 0x235   : > { %v970_v36 = vsel %vm969_vm9, %v851_v9, 0 }
 0x236   : > { %v971_v46 = vsel %vm932_vm3, %v970_v36, 0 }
 0x237   : > { %v972_v27 = vrot.slane %v971_v46, 4 }
 0x239   : > { %v973_v39 = vadd.s32 %v972_v27, %v971_v46 }
 0x23b   : > { %v974_v47 = vrot.slane %v973_v39, 2 }
 0x23d   : > { %v975_v48 = vadd.s32 %v974_v47, %v973_v39 }
 0x23f   : > { %v976_v44 = vrot.slane %v975_v48, 1 }
 0x241   : > { %v977_v50 = vadd.s32 %v976_v44, %v975_v48 }
 0x243   : > { %978 = vrot.lane.b32.xlu1 %v977_v50, %s1256_s10  ;;  %vm982_vm2 = vcmp.eq.s32.totalorder %v1338_v26, %v977_v50 }
 0x244   : > { %v983_v15 = vsel %vm982_vm2, %v776_v16, 0 }
 0x245   : > { %v984_v25 = vsel %vm932_vm3, %v983_v15, 0 }
 0x246   : > { %v985_v9 = vrot.slane %v984_v25, 4 }
 0x248   : > { %v986_v51 = vadd.s32 %v985_v9, %v984_v25 }
 0x24a   : > { %v987_v37 = vrot.slane %v986_v51, 2 }
 0x24c   : > { %v988_v52 = vadd.s32 %v987_v37, %v986_v51 }
 0x24e   : > { %v989_v49 = vrot.slane %v988_v52, 1 }
 0x250   : > { %v990_v55 = vadd.s32 %v989_v49, %v988_v52 }
 0x252   : > { %991 = vrot.lane.b32.xlu0 %v990_v55, %s1255_s9  ;;  %vm995_vm13 = vcmp.eq.s32.totalorder %v1338_v26, %v990_v55 }
 0x253   : > { %v996_v59 = vsel %vm995_vm13, %v701_v5, 0 }
 0x254   : > { %v997_v12 = vsel %vm932_vm3, %v996_v59, 0 }
 0x255   : > { %v998_v16 = vrot.slane %v997_v12, 4 }
 0x257   : > { %v999_v53 = vadd.s32 %v998_v16, %v997_v12 }
 0x259   : > { %v1000_v54 = vrot.slane %v999_v53, 2 }
 0x25b   : > { %v1001_v63 = vadd.s32 %v1000_v54, %v999_v53 }
 0x25d   : > { %v1002_v56 = vrot.slane %v1001_v63, 1 }
 0x25f   : > { %v1003_v57 = vadd.s32 %v1002_v56, %v1001_v63 }
 0x261   : > { %1004 = vrot.lane.b32.xlu1 %v1003_v57, %s1258_s12  ;;  %vm1008_vm0 = vcmp.eq.s32.totalorder %v1338_v26, %v1003_v57 }
 0x262   : > { %v1009_v58 = vsel %vm1008_vm0, %v626_v8, 0 }
 0x263   : > { %v1010_v0 = vsel %vm932_vm3, %v1009_v58, 0 }
 0x264   : > { %v1011_v5 = vrot.slane %v1010_v0, 4 }
 0x266   : > { %v1012_v6 = vadd.s32 %v1011_v5, %v1010_v0 }
 0x268   : > { %v1013_v30 = vrot.slane %v1012_v6, 2 }
 0x26a   : > { %v1014_v60 = vadd.s32 %v1013_v30, %v1012_v6 }
 0x26c   : > { %v1015_v62 = vrot.slane %v1014_v60, 1 }
 0x26e   : > { %v1016_v3 = vadd.s32 %v1015_v62, %v1014_v60 }
 0x270   : > { %1017 = vrot.lane.b32.xlu0 %v1016_v3, %s1257_s11  ;;  %vm1021_vm5 = vcmp.eq.s32.totalorder %v1338_v26, %v1016_v3 }
 0x271   : > { %v1022_v61 = vsel %vm1021_vm5, %v551_v13, 0 }
 0x272   : > { %v1023_v4 = vsel %vm932_vm3, %v1022_v61, 0 }
 0x273   : > { %v1024_v8 = vrot.slane %v1023_v4, 4 }
 0x275   : > { %v1025_v18 = vadd.s32 %v1024_v8, %v1023_v4 }
 0x277   : > { %v1026_v19 = vrot.slane %v1025_v18, 2 }
 0x279   : > { %v1027_v24 = vadd.s32 %v1026_v19, %v1025_v18 }
 0x27b   : > { %v1028_v28 = vrot.slane %v1027_v24, 1 }
 0x27d   : > { %v1029_v1 = vadd.s32 %v1028_v28, %v1027_v24 }
 0x27f   : > { %1030 = vrot.lane.b32.xlu1 %v1029_v1, %s1259_s13  ;;  %vm1034_vm8 = vcmp.eq.s32.totalorder %v1338_v26, %v1029_v1 }
 0x280   : > { %v1035_v7 = vsel %vm1034_vm8, %v476_v29, 0 }
 0x281   : > { %v1036_v26 = vsel %vm932_vm3, %v1035_v7, 0 }
 0x282   : > { %v1037_v20 = vrot.slane %v1036_v26, 4 }
 0x284   : > { %v1038_v2 = vadd.s32 %v1037_v20, %v1036_v26 }
 0x286   : > { %v1039_v34 = vrot.slane %v1038_v2, 2 }
 0x288   : > { %v1040_v38 = vadd.s32 %v1039_v34, %v1038_v2 }
 0x28a   : > { %v1041_v40 = vrot.slane %v1040_v38, 1 }
 0x28c   : > { %v1042_v41 = vadd.s32 %v1041_v40, %v1040_v38 }
 0x297   : > { %v953_v11 = vpop.permute.xlu1 %952 }
 0x298   : > { %955 = vst.msk [vmem:[%s248_s21] sm:$0x1] %vm954_vm1, %v953_v11 }
 0x2a6   : > { %v966_v13 = vpop.permute.xlu0 %965 }
 0x2a7   : > { %968 = vst.msk [vmem:[%s248_s21] sm:$0x1] %vm967_vm10, %v966_v13 }
 0x2b5   : > { %v979_v23 = vpop.permute.xlu1 %978 }
 0x2b6   : > { %981 = vst.msk [vmem:[%s248_s21] sm:$0x1] %vm980_vm12, %v979_v23 }
 0x2c4   : > { %v992_v33 = vpop.permute.xlu0 %991 }
 0x2c5   : > { %994 = vst.msk [vmem:[%s248_s21] sm:$0x1] %vm993_vm14, %v992_v33 }
 0x2d3   : > { %v1005_v14 = vpop.permute.xlu1 %1004 }
 0x2d4   : > { %1007 = vst.msk [vmem:[%s248_s21] sm:$0x1] %vm1006_vm15, %v1005_v14 }
 0x2e2   : > { %v1018_v10 = vpop.permute.xlu0 %1017 }
 0x2e3   : > { %1020 = vst.msk [vmem:[%s248_s21] sm:$0x1] %vm1019_vm4, %v1018_v10 }
 0x2f1   : > { %v1031_v42 = vpop.permute.xlu1 %1030 }
 0x2f2   : > { %1033 = vst.msk [vmem:[%s248_s21] sm:$0x1] %vm1032_vm6, %v1031_v42 }
 0x2f3   : > { %1044 = vst.msk [vmem:[%s248_s21] sm:$0x1] %vm1043_vm7, %v1042_v41 }
 0x2f4 PF: > { %s16_s18 = sadd.s32 1, %s1238_s18  }
 0x2f5   : > { %p13_p4 = scmp.ge.s32.totalorder %s16_s18, 4  }
 0x2f7   :  { %15 = sbr.rel (!%p13_p4) target bundleno = 1 (0x1), region = 81 }

</bundles_post_ra>
